<compile_context>
chip_gen: v6e
topology: v6e:2x2x1
jax: 0.10.0
libtpu: 0.0.40
codegen_flags: <defaults>
</compile_context>

<pallas_src>
import functools

import jax
import jax.numpy as jnp
import numpy as np
from jax.experimental import pallas as pl
from jax.experimental.pallas import tpu as pltpu


def _iterative_select(values, lane, k, *, largest, n_valid, npad):
    """int32 0/1 mask of the k largest (or smallest) entries of each row.

    Tie-break matches a stable ascending sort of the flattened CAM:
      largest : among equal values, the larger original index wins  (== idx[-k:])
      smallest: among equal values, the smaller original index wins (== idx[:k])
    """
    bt = values.shape[0]
    if k <= 0:
        return jnp.zeros((bt, npad), dtype=jnp.int32)

    if largest:
        sentinel = jnp.float32(-jnp.inf)
        idx_fill = jnp.int32(-1)
        reduce_fn = lambda a: jnp.max(a, axis=1, keepdims=True)
    else:
        sentinel = jnp.float32(jnp.inf)
        idx_fill = jnp.int32(npad)
        reduce_fn = lambda a: jnp.min(a, axis=1, keepdims=True)

    # Lane padding (if N not a multiple of 128) is neutralized with the sentinel so it
    # can never be selected; batch-padding rows are simply discarded by the wrapper.
    if npad > n_valid:
        work0 = jnp.where(lane < n_valid, values, sentinel)
    else:
        work0 = values
    mask0 = jnp.zeros((bt, npad), dtype=jnp.int32)

    def body(_, carry):
        work, mask = carry
        ext = reduce_fn(work)                              # (bt, 1) extreme value (XLU)
        cand = jnp.where(work == ext, lane, idx_fill)      # tie-break by index
        idx_sel = reduce_fn(cand)                          # (bt, 1) selected index (XLU)
        sel = lane == idx_sel                              # exactly one lane per row
        mask = jnp.where(sel, jnp.int32(1), mask)
        work = jnp.where(sel, sentinel, work)              # remove from further passes
        return work, mask

    unroll = True if k <= 64 else False                    # short fixed loop: give LLO visibility
    _, mask = jax.lax.fori_loop(0, k, body, (work0, mask0), unroll=unroll)
    return mask


def _pseudo_mask_kernel(x_ref, out_ref, *, n_valid, min_, max_, ignore_idx):
    """One batch tile (8 images) per grid step.

    x_ref:   (8, Np) float32 -- flattened, lane-padded CAMs
    out_ref: (8, Np) int32   -- seed mask (1 = fg, 0 = bg, ignore_idx elsewhere)
    """
    bt, npad = x_ref.shape
    v = x_ref[...]
    lane = jax.lax.broadcasted_iota(jnp.int32, (bt, npad), 1)

    fg = _iterative_select(v, lane, max_, largest=True, n_valid=n_valid, npad=npad)
    bg = _iterative_select(v, lane, min_, largest=False, n_valid=n_valid, npad=npad)

    # fg + bg == 2  =>  drop from both (PyTorch "outer == 2" rule).
    keep_fg = (fg == 1) & (bg == 0)
    keep_bg = (bg == 1) & (fg == 0)

    seed = jnp.full((bt, npad), ignore_idx, dtype=jnp.int32)
    seed = jnp.where(keep_fg, jnp.int32(1), seed)
    seed = jnp.where(keep_bg, jnp.int32(0), seed)
    out_ref[...] = seed


def get_pseudo_mask_slfcams(x, *, min_, max_, min_ext, max_ext, block, ksz,
                            seg_ignore_idx, batch_tile=8):
    """Pallas implementation of GetPseudoMaskSLFCAMS.forward (deterministic path)."""
    assert ksz == 1, "TODO(synk): ksz > 1 (dilation) path not implemented"
    assert block == 1, "TODO(synk): block > 1 path not implemented"
    assert min_ == min_ext and max_ == max_ext, \
        "TODO(synk): stochastic multinomial sampling path not implemented"
    assert min_ >= 0 and max_ >= 0 and (min_ + max_) > 0

    b, d, h, w = x.shape
    assert d == 1
    N = h * w
    assert max_ <= N and min_ <= N

    Np = ((N + 127) // 128) * 128                       # lane-dense last dim (128-multiple)
    Bp = ((b + batch_tile - 1) // batch_tile) * batch_tile  # 8-sublane-aligned batch

    x_flat = x.reshape(b, N).astype(jnp.float32)
    x_pad = jnp.pad(x_flat, ((0, Bp - b), (0, Np - N)))

    kernel = functools.partial(
        _pseudo_mask_kernel, n_valid=N, min_=min_, max_=max_, ignore_idx=seg_ignore_idx)

    out_pad = pl.pallas_call(
        kernel,
        out_shape=jax.ShapeDtypeStruct((Bp, Np), jnp.int32),
        grid_spec=pltpu.PrefetchScalarGridSpec(
            num_scalar_prefetch=0,
            grid=(Bp // batch_tile,),
            in_specs=[pl.BlockSpec((batch_tile, Np), lambda i: (i, 0))],
            out_specs=pl.BlockSpec((batch_tile, Np), lambda i: (i, 0)),
        ),
        compiler_params=pltpu.CompilerParams(
            dimension_semantics=("parallel",)),
    )(x_pad)

    return out_pad[:b, :N].reshape(b, h, w)


def _reference_numpy(x, *, min_, max_, ignore_idx):
    """Pure-numpy replica of the PyTorch forward (deterministic path)."""
    b, d, h, w = x.shape
    N = h * w
    xn = np.asarray(x, dtype=np.float32).reshape(b, N)
    out = np.zeros((b, N), dtype=np.int32)
    for i in range(b):
        idx = np.argsort(xn[i], kind="stable")
        fg = np.zeros(N, dtype=np.int32)
        bg = np.zeros(N, dtype=np.int32)
        if max_ > 0:
            fg[idx[-max_:]] = 1
        if min_ > 0:
            bg[idx[:min_]] = 1
        outer = fg + bg
        fg[outer == 2] = 0
        bg[outer == 2] = 0
        seed = np.full(N, ignore_idx, dtype=np.int32)
        seed[fg == 1] = 1
        seed[bg == 1] = 0
        out[i] = seed
    return out.reshape(b, h, w)


if __name__ == "__main__":
    # Module hyper-parameters (deterministic configuration).
    MIN_ = 10
    MAX_ = 20
    MIN_EXT = 10
    MAX_EXT = 20
    BLOCK = 1
    KSZ = 1
    SEG_IGNORE_IDX = -255

    key = jax.random.PRNGKey(0)
    k1, k2 = jax.random.split(key)

    # Test 1: aligned shapes (N = 256 is a multiple of 128).
    b, h, w = 2, 16, 16
    x = jax.random.uniform(k1, (b, 1, h, w), dtype=jnp.float32)
    out = get_pseudo_mask_slfcams(
        x, min_=MIN_, max_=MAX_, min_ext=MIN_EXT, max_ext=MAX_EXT,
        block=BLOCK, ksz=KSZ, seg_ignore_idx=SEG_IGNORE_IDX)
    out = jax.block_until_ready(out)
    ref = _reference_numpy(x, min_=MIN_, max_=MAX_, ignore_idx=SEG_IGNORE_IDX)
    np.testing.assert_array_equal(np.asarray(out), ref)

    # Test 2: unaligned shapes (exercise the batch and lane padding paths).
    b2, h2, w2 = 3, 10, 12
    x2 = jax.random.uniform(k2, (b2, 1, h2, w2), dtype=jnp.float32)
    out2 = get_pseudo_mask_slfcams(
        x2, min_=MIN_, max_=MAX_, min_ext=MIN_EXT, max_ext=MAX_EXT,
        block=BLOCK, ksz=KSZ, seg_ignore_idx=SEG_IGNORE_IDX)
    out2 = jax.block_until_ready(out2)
    ref2 = _reference_numpy(x2, min_=MIN_, max_=MAX_, ignore_idx=SEG_IGNORE_IDX)
    np.testing.assert_array_equal(np.asarray(out2), ref2)

    print("KERNEL_OK")
</pallas_src>

<mosaic_0001>
module attributes {stable_mosaic.version = 11 : i64} {
  func.func @_pseudo_mask_kernel(%arg0: i32, %arg1: memref<8x256xf32, #tpu.memory_space<vmem>>, %arg2: memref<8x256xi32, #tpu.memory_space<vmem>>) attributes {dimension_semantics = [#tpu.dimension_semantics<parallel>], iteration_bounds = array<i64: 1>, scalar_prefetch = 0 : i64, scratch_operands = 0 : i64, tpu.core_type = #tpu.core_type<tc>, window_params = [{transform_indices = @transform_0, window_bounds = array<i64: 8, 256>}, {transform_indices = @transform_1, window_bounds = array<i64: 8, 256>}]} {
    %c0 = arith.constant 0 : index
    %c0_0 = arith.constant 0 : index
    %0 = vector.load %arg1[%c0, %c0_0] : memref<8x256xf32, #tpu.memory_space<vmem>>, vector<8x256xf32>
    %1 = tpu.iota {dimensions = array<i32: 1>} : vector<8x256xi32>
    %c0_i32 = arith.constant 0 : i32
    %2 = vector.broadcast %c0_i32 : i32 to vector<8x256xi32>
    %c-1_i32 = arith.constant -1 : i32
    %cst = arith.constant 0xFF800000 : f32
    %c0_i32_1 = arith.constant 0 : i32
    %cst_2 = arith.constant dense<0xFF800000> : vector<8xf32>
    %3 = vector.multi_reduction <maximumf>, %0, %cst_2 [1] : vector<8x256xf32> to vector<8xf32>
    %4 = vector.shape_cast %3 : vector<8xf32> to vector<8x1xf32>
    %5 = vector.broadcast %4 : vector<8x1xf32> to vector<8x256xf32>
    %6 = arith.cmpf oeq, %0, %5 : vector<8x256xf32>
    %7 = vector.broadcast %c-1_i32 : i32 to vector<8x256xi32>
    %8 = arith.select %6, %1, %7 : vector<8x256xi1>, vector<8x256xi32>
    %cst_3 = arith.constant dense<-2147483648> : vector<8xi32>
    %9 = vector.multi_reduction <maxsi>, %8, %cst_3 [1] : vector<8x256xi32> to vector<8xi32>
    %10 = vector.shape_cast %9 : vector<8xi32> to vector<8x1xi32>
    %11 = vector.broadcast %10 : vector<8x1xi32> to vector<8x256xi32>
    %12 = arith.cmpi eq, %1, %11 : vector<8x256xi32>
    %c1_i32 = arith.constant 1 : i32
    %13 = vector.broadcast %c1_i32 : i32 to vector<8x256xi32>
    %14 = arith.select %12, %13, %2 : vector<8x256xi1>, vector<8x256xi32>
    %15 = vector.broadcast %cst : f32 to vector<8x256xf32>
    %16 = arith.select %12, %15, %0 : vector<8x256xi1>, vector<8x256xf32>
    %c1_i32_4 = arith.constant 1 : i32
    %cst_5 = arith.constant dense<0xFF800000> : vector<8xf32>
    %17 = vector.multi_reduction <maximumf>, %16, %cst_5 [1] : vector<8x256xf32> to vector<8xf32>
    %18 = vector.shape_cast %17 : vector<8xf32> to vector<8x1xf32>
    %19 = vector.broadcast %18 : vector<8x1xf32> to vector<8x256xf32>
    %20 = arith.cmpf oeq, %16, %19 : vector<8x256xf32>
    %21 = vector.broadcast %c-1_i32 : i32 to vector<8x256xi32>
    %22 = arith.select %20, %1, %21 : vector<8x256xi1>, vector<8x256xi32>
    %cst_6 = arith.constant dense<-2147483648> : vector<8xi32>
    %23 = vector.multi_reduction <maxsi>, %22, %cst_6 [1] : vector<8x256xi32> to vector<8xi32>
    %24 = vector.shape_cast %23 : vector<8xi32> to vector<8x1xi32>
    %25 = vector.broadcast %24 : vector<8x1xi32> to vector<8x256xi32>
    %26 = arith.cmpi eq, %1, %25 : vector<8x256xi32>
    %c1_i32_7 = arith.constant 1 : i32
    %27 = vector.broadcast %c1_i32_7 : i32 to vector<8x256xi32>
    %28 = arith.select %26, %27, %14 : vector<8x256xi1>, vector<8x256xi32>
    %29 = vector.broadcast %cst : f32 to vector<8x256xf32>
    %30 = arith.select %26, %29, %16 : vector<8x256xi1>, vector<8x256xf32>
    %c2_i32 = arith.constant 2 : i32
    %cst_8 = arith.constant dense<0xFF800000> : vector<8xf32>
    %31 = vector.multi_reduction <maximumf>, %30, %cst_8 [1] : vector<8x256xf32> to vector<8xf32>
    %32 = vector.shape_cast %31 : vector<8xf32> to vector<8x1xf32>
    %33 = vector.broadcast %32 : vector<8x1xf32> to vector<8x256xf32>
    %34 = arith.cmpf oeq, %30, %33 : vector<8x256xf32>
    %35 = vector.broadcast %c-1_i32 : i32 to vector<8x256xi32>
    %36 = arith.select %34, %1, %35 : vector<8x256xi1>, vector<8x256xi32>
    %cst_9 = arith.constant dense<-2147483648> : vector<8xi32>
    %37 = vector.multi_reduction <maxsi>, %36, %cst_9 [1] : vector<8x256xi32> to vector<8xi32>
    %38 = vector.shape_cast %37 : vector<8xi32> to vector<8x1xi32>
    %39 = vector.broadcast %38 : vector<8x1xi32> to vector<8x256xi32>
    %40 = arith.cmpi eq, %1, %39 : vector<8x256xi32>
    %c1_i32_10 = arith.constant 1 : i32
    %41 = vector.broadcast %c1_i32_10 : i32 to vector<8x256xi32>
    %42 = arith.select %40, %41, %28 : vector<8x256xi1>, vector<8x256xi32>
    %43 = vector.broadcast %cst : f32 to vector<8x256xf32>
    %44 = arith.select %40, %43, %30 : vector<8x256xi1>, vector<8x256xf32>
    %c3_i32 = arith.constant 3 : i32
    %cst_11 = arith.constant dense<0xFF800000> : vector<8xf32>
    %45 = vector.multi_reduction <maximumf>, %44, %cst_11 [1] : vector<8x256xf32> to vector<8xf32>
    %46 = vector.shape_cast %45 : vector<8xf32> to vector<8x1xf32>
    %47 = vector.broadcast %46 : vector<8x1xf32> to vector<8x256xf32>
    %48 = arith.cmpf oeq, %44, %47 : vector<8x256xf32>
    %49 = vector.broadcast %c-1_i32 : i32 to vector<8x256xi32>
    %50 = arith.select %48, %1, %49 : vector<8x256xi1>, vector<8x256xi32>
    %cst_12 = arith.constant dense<-2147483648> : vector<8xi32>
    %51 = vector.multi_reduction <maxsi>, %50, %cst_12 [1] : vector<8x256xi32> to vector<8xi32>
    %52 = vector.shape_cast %51 : vector<8xi32> to vector<8x1xi32>
    %53 = vector.broadcast %52 : vector<8x1xi32> to vector<8x256xi32>
    %54 = arith.cmpi eq, %1, %53 : vector<8x256xi32>
    %c1_i32_13 = arith.constant 1 : i32
    %55 = vector.broadcast %c1_i32_13 : i32 to vector<8x256xi32>
    %56 = arith.select %54, %55, %42 : vector<8x256xi1>, vector<8x256xi32>
    %57 = vector.broadcast %cst : f32 to vector<8x256xf32>
    %58 = arith.select %54, %57, %44 : vector<8x256xi1>, vector<8x256xf32>
    %c4_i32 = arith.constant 4 : i32
    %cst_14 = arith.constant dense<0xFF800000> : vector<8xf32>
    %59 = vector.multi_reduction <maximumf>, %58, %cst_14 [1] : vector<8x256xf32> to vector<8xf32>
    %60 = vector.shape_cast %59 : vector<8xf32> to vector<8x1xf32>
    %61 = vector.broadcast %60 : vector<8x1xf32> to vector<8x256xf32>
    %62 = arith.cmpf oeq, %58, %61 : vector<8x256xf32>
    %63 = vector.broadcast %c-1_i32 : i32 to vector<8x256xi32>
    %64 = arith.select %62, %1, %63 : vector<8x256xi1>, vector<8x256xi32>
    %cst_15 = arith.constant dense<-2147483648> : vector<8xi32>
    %65 = vector.multi_reduction <maxsi>, %64, %cst_15 [1] : vector<8x256xi32> to vector<8xi32>
    %66 = vector.shape_cast %65 : vector<8xi32> to vector<8x1xi32>
    %67 = vector.broadcast %66 : vector<8x1xi32> to vector<8x256xi32>
    %68 = arith.cmpi eq, %1, %67 : vector<8x256xi32>
    %c1_i32_16 = arith.constant 1 : i32
    %69 = vector.broadcast %c1_i32_16 : i32 to vector<8x256xi32>
    %70 = arith.select %68, %69, %56 : vector<8x256xi1>, vector<8x256xi32>
    %71 = vector.broadcast %cst : f32 to vector<8x256xf32>
    %72 = arith.select %68, %71, %58 : vector<8x256xi1>, vector<8x256xf32>
    %c5_i32 = arith.constant 5 : i32
    %cst_17 = arith.constant dense<0xFF800000> : vector<8xf32>
    %73 = vector.multi_reduction <maximumf>, %72, %cst_17 [1] : vector<8x256xf32> to vector<8xf32>
    %74 = vector.shape_cast %73 : vector<8xf32> to vector<8x1xf32>
    %75 = vector.broadcast %74 : vector<8x1xf32> to vector<8x256xf32>
    %76 = arith.cmpf oeq, %72, %75 : vector<8x256xf32>
    %77 = vector.broadcast %c-1_i32 : i32 to vector<8x256xi32>
    %78 = arith.select %76, %1, %77 : vector<8x256xi1>, vector<8x256xi32>
    %cst_18 = arith.constant dense<-2147483648> : vector<8xi32>
    %79 = vector.multi_reduction <maxsi>, %78, %cst_18 [1] : vector<8x256xi32> to vector<8xi32>
    %80 = vector.shape_cast %79 : vector<8xi32> to vector<8x1xi32>
    %81 = vector.broadcast %80 : vector<8x1xi32> to vector<8x256xi32>
    %82 = arith.cmpi eq, %1, %81 : vector<8x256xi32>
    %c1_i32_19 = arith.constant 1 : i32
    %83 = vector.broadcast %c1_i32_19 : i32 to vector<8x256xi32>
    %84 = arith.select %82, %83, %70 : vector<8x256xi1>, vector<8x256xi32>
    %85 = vector.broadcast %cst : f32 to vector<8x256xf32>
    %86 = arith.select %82, %85, %72 : vector<8x256xi1>, vector<8x256xf32>
    %c6_i32 = arith.constant 6 : i32
    %cst_20 = arith.constant dense<0xFF800000> : vector<8xf32>
    %87 = vector.multi_reduction <maximumf>, %86, %cst_20 [1] : vector<8x256xf32> to vector<8xf32>
    %88 = vector.shape_cast %87 : vector<8xf32> to vector<8x1xf32>
    %89 = vector.broadcast %88 : vector<8x1xf32> to vector<8x256xf32>
    %90 = arith.cmpf oeq, %86, %89 : vector<8x256xf32>
    %91 = vector.broadcast %c-1_i32 : i32 to vector<8x256xi32>
    %92 = arith.select %90, %1, %91 : vector<8x256xi1>, vector<8x256xi32>
    %cst_21 = arith.constant dense<-2147483648> : vector<8xi32>
    %93 = vector.multi_reduction <maxsi>, %92, %cst_21 [1] : vector<8x256xi32> to vector<8xi32>
    %94 = vector.shape_cast %93 : vector<8xi32> to vector<8x1xi32>
    %95 = vector.broadcast %94 : vector<8x1xi32> to vector<8x256xi32>
    %96 = arith.cmpi eq, %1, %95 : vector<8x256xi32>
    %c1_i32_22 = arith.constant 1 : i32
    %97 = vector.broadcast %c1_i32_22 : i32 to vector<8x256xi32>
    %98 = arith.select %96, %97, %84 : vector<8x256xi1>, vector<8x256xi32>
    %99 = vector.broadcast %cst : f32 to vector<8x256xf32>
    %100 = arith.select %96, %99, %86 : vector<8x256xi1>, vector<8x256xf32>
    %c7_i32 = arith.constant 7 : i32
    %cst_23 = arith.constant dense<0xFF800000> : vector<8xf32>
    %101 = vector.multi_reduction <maximumf>, %100, %cst_23 [1] : vector<8x256xf32> to vector<8xf32>
    %102 = vector.shape_cast %101 : vector<8xf32> to vector<8x1xf32>
    %103 = vector.broadcast %102 : vector<8x1xf32> to vector<8x256xf32>
    %104 = arith.cmpf oeq, %100, %103 : vector<8x256xf32>
    %105 = vector.broadcast %c-1_i32 : i32 to vector<8x256xi32>
    %106 = arith.select %104, %1, %105 : vector<8x256xi1>, vector<8x256xi32>
    %cst_24 = arith.constant dense<-2147483648> : vector<8xi32>
    %107 = vector.multi_reduction <maxsi>, %106, %cst_24 [1] : vector<8x256xi32> to vector<8xi32>
    %108 = vector.shape_cast %107 : vector<8xi32> to vector<8x1xi32>
    %109 = vector.broadcast %108 : vector<8x1xi32> to vector<8x256xi32>
    %110 = arith.cmpi eq, %1, %109 : vector<8x256xi32>
    %c1_i32_25 = arith.constant 1 : i32
    %111 = vector.broadcast %c1_i32_25 : i32 to vector<8x256xi32>
    %112 = arith.select %110, %111, %98 : vector<8x256xi1>, vector<8x256xi32>
    %113 = vector.broadcast %cst : f32 to vector<8x256xf32>
    %114 = arith.select %110, %113, %100 : vector<8x256xi1>, vector<8x256xf32>
    %c8_i32 = arith.constant 8 : i32
    %cst_26 = arith.constant dense<0xFF800000> : vector<8xf32>
    %115 = vector.multi_reduction <maximumf>, %114, %cst_26 [1] : vector<8x256xf32> to vector<8xf32>
    %116 = vector.shape_cast %115 : vector<8xf32> to vector<8x1xf32>
    %117 = vector.broadcast %116 : vector<8x1xf32> to vector<8x256xf32>
    %118 = arith.cmpf oeq, %114, %117 : vector<8x256xf32>
    %119 = vector.broadcast %c-1_i32 : i32 to vector<8x256xi32>
    %120 = arith.select %118, %1, %119 : vector<8x256xi1>, vector<8x256xi32>
    %cst_27 = arith.constant dense<-2147483648> : vector<8xi32>
    %121 = vector.multi_reduction <maxsi>, %120, %cst_27 [1] : vector<8x256xi32> to vector<8xi32>
    %122 = vector.shape_cast %121 : vector<8xi32> to vector<8x1xi32>
    %123 = vector.broadcast %122 : vector<8x1xi32> to vector<8x256xi32>
    %124 = arith.cmpi eq, %1, %123 : vector<8x256xi32>
    %c1_i32_28 = arith.constant 1 : i32
    %125 = vector.broadcast %c1_i32_28 : i32 to vector<8x256xi32>
    %126 = arith.select %124, %125, %112 : vector<8x256xi1>, vector<8x256xi32>
    %127 = vector.broadcast %cst : f32 to vector<8x256xf32>
    %128 = arith.select %124, %127, %114 : vector<8x256xi1>, vector<8x256xf32>
    %c9_i32 = arith.constant 9 : i32
    %cst_29 = arith.constant dense<0xFF800000> : vector<8xf32>
    %129 = vector.multi_reduction <maximumf>, %128, %cst_29 [1] : vector<8x256xf32> to vector<8xf32>
    %130 = vector.shape_cast %129 : vector<8xf32> to vector<8x1xf32>
    %131 = vector.broadcast %130 : vector<8x1xf32> to vector<8x256xf32>
    %132 = arith.cmpf oeq, %128, %131 : vector<8x256xf32>
    %133 = vector.broadcast %c-1_i32 : i32 to vector<8x256xi32>
    %134 = arith.select %132, %1, %133 : vector<8x256xi1>, vector<8x256xi32>
    %cst_30 = arith.constant dense<-2147483648> : vector<8xi32>
    %135 = vector.multi_reduction <maxsi>, %134, %cst_30 [1] : vector<8x256xi32> to vector<8xi32>
    %136 = vector.shape_cast %135 : vector<8xi32> to vector<8x1xi32>
    %137 = vector.broadcast %136 : vector<8x1xi32> to vector<8x256xi32>
    %138 = arith.cmpi eq, %1, %137 : vector<8x256xi32>
    %c1_i32_31 = arith.constant 1 : i32
    %139 = vector.broadcast %c1_i32_31 : i32 to vector<8x256xi32>
    %140 = arith.select %138, %139, %126 : vector<8x256xi1>, vector<8x256xi32>
    %141 = vector.broadcast %cst : f32 to vector<8x256xf32>
    %142 = arith.select %138, %141, %128 : vector<8x256xi1>, vector<8x256xf32>
    %c10_i32 = arith.constant 10 : i32
    %cst_32 = arith.constant dense<0xFF800000> : vector<8xf32>
    %143 = vector.multi_reduction <maximumf>, %142, %cst_32 [1] : vector<8x256xf32> to vector<8xf32>
    %144 = vector.shape_cast %143 : vector<8xf32> to vector<8x1xf32>
    %145 = vector.broadcast %144 : vector<8x1xf32> to vector<8x256xf32>
    %146 = arith.cmpf oeq, %142, %145 : vector<8x256xf32>
    %147 = vector.broadcast %c-1_i32 : i32 to vector<8x256xi32>
    %148 = arith.select %146, %1, %147 : vector<8x256xi1>, vector<8x256xi32>
    %cst_33 = arith.constant dense<-2147483648> : vector<8xi32>
    %149 = vector.multi_reduction <maxsi>, %148, %cst_33 [1] : vector<8x256xi32> to vector<8xi32>
    %150 = vector.shape_cast %149 : vector<8xi32> to vector<8x1xi32>
    %151 = vector.broadcast %150 : vector<8x1xi32> to vector<8x256xi32>
    %152 = arith.cmpi eq, %1, %151 : vector<8x256xi32>
    %c1_i32_34 = arith.constant 1 : i32
    %153 = vector.broadcast %c1_i32_34 : i32 to vector<8x256xi32>
    %154 = arith.select %152, %153, %140 : vector<8x256xi1>, vector<8x256xi32>
    %155 = vector.broadcast %cst : f32 to vector<8x256xf32>
    %156 = arith.select %152, %155, %142 : vector<8x256xi1>, vector<8x256xf32>
    %c11_i32 = arith.constant 11 : i32
    %cst_35 = arith.constant dense<0xFF800000> : vector<8xf32>
    %157 = vector.multi_reduction <maximumf>, %156, %cst_35 [1] : vector<8x256xf32> to vector<8xf32>
    %158 = vector.shape_cast %157 : vector<8xf32> to vector<8x1xf32>
    %159 = vector.broadcast %158 : vector<8x1xf32> to vector<8x256xf32>
    %160 = arith.cmpf oeq, %156, %159 : vector<8x256xf32>
    %161 = vector.broadcast %c-1_i32 : i32 to vector<8x256xi32>
    %162 = arith.select %160, %1, %161 : vector<8x256xi1>, vector<8x256xi32>
    %cst_36 = arith.constant dense<-2147483648> : vector<8xi32>
    %163 = vector.multi_reduction <maxsi>, %162, %cst_36 [1] : vector<8x256xi32> to vector<8xi32>
    %164 = vector.shape_cast %163 : vector<8xi32> to vector<8x1xi32>
    %165 = vector.broadcast %164 : vector<8x1xi32> to vector<8x256xi32>
    %166 = arith.cmpi eq, %1, %165 : vector<8x256xi32>
    %c1_i32_37 = arith.constant 1 : i32
    %167 = vector.broadcast %c1_i32_37 : i32 to vector<8x256xi32>
    %168 = arith.select %166, %167, %154 : vector<8x256xi1>, vector<8x256xi32>
    %169 = vector.broadcast %cst : f32 to vector<8x256xf32>
    %170 = arith.select %166, %169, %156 : vector<8x256xi1>, vector<8x256xf32>
    %c12_i32 = arith.constant 12 : i32
    %cst_38 = arith.constant dense<0xFF800000> : vector<8xf32>
    %171 = vector.multi_reduction <maximumf>, %170, %cst_38 [1] : vector<8x256xf32> to vector<8xf32>
    %172 = vector.shape_cast %171 : vector<8xf32> to vector<8x1xf32>
    %173 = vector.broadcast %172 : vector<8x1xf32> to vector<8x256xf32>
    %174 = arith.cmpf oeq, %170, %173 : vector<8x256xf32>
    %175 = vector.broadcast %c-1_i32 : i32 to vector<8x256xi32>
    %176 = arith.select %174, %1, %175 : vector<8x256xi1>, vector<8x256xi32>
    %cst_39 = arith.constant dense<-2147483648> : vector<8xi32>
    %177 = vector.multi_reduction <maxsi>, %176, %cst_39 [1] : vector<8x256xi32> to vector<8xi32>
    %178 = vector.shape_cast %177 : vector<8xi32> to vector<8x1xi32>
    %179 = vector.broadcast %178 : vector<8x1xi32> to vector<8x256xi32>
    %180 = arith.cmpi eq, %1, %179 : vector<8x256xi32>
    %c1_i32_40 = arith.constant 1 : i32
    %181 = vector.broadcast %c1_i32_40 : i32 to vector<8x256xi32>
    %182 = arith.select %180, %181, %168 : vector<8x256xi1>, vector<8x256xi32>
    %183 = vector.broadcast %cst : f32 to vector<8x256xf32>
    %184 = arith.select %180, %183, %170 : vector<8x256xi1>, vector<8x256xf32>
    %c13_i32 = arith.constant 13 : i32
    %cst_41 = arith.constant dense<0xFF800000> : vector<8xf32>
    %185 = vector.multi_reduction <maximumf>, %184, %cst_41 [1] : vector<8x256xf32> to vector<8xf32>
    %186 = vector.shape_cast %185 : vector<8xf32> to vector<8x1xf32>
    %187 = vector.broadcast %186 : vector<8x1xf32> to vector<8x256xf32>
    %188 = arith.cmpf oeq, %184, %187 : vector<8x256xf32>
    %189 = vector.broadcast %c-1_i32 : i32 to vector<8x256xi32>
    %190 = arith.select %188, %1, %189 : vector<8x256xi1>, vector<8x256xi32>
    %cst_42 = arith.constant dense<-2147483648> : vector<8xi32>
    %191 = vector.multi_reduction <maxsi>, %190, %cst_42 [1] : vector<8x256xi32> to vector<8xi32>
    %192 = vector.shape_cast %191 : vector<8xi32> to vector<8x1xi32>
    %193 = vector.broadcast %192 : vector<8x1xi32> to vector<8x256xi32>
    %194 = arith.cmpi eq, %1, %193 : vector<8x256xi32>
    %c1_i32_43 = arith.constant 1 : i32
    %195 = vector.broadcast %c1_i32_43 : i32 to vector<8x256xi32>
    %196 = arith.select %194, %195, %182 : vector<8x256xi1>, vector<8x256xi32>
    %197 = vector.broadcast %cst : f32 to vector<8x256xf32>
    %198 = arith.select %194, %197, %184 : vector<8x256xi1>, vector<8x256xf32>
    %c14_i32 = arith.constant 14 : i32
    %cst_44 = arith.constant dense<0xFF800000> : vector<8xf32>
    %199 = vector.multi_reduction <maximumf>, %198, %cst_44 [1] : vector<8x256xf32> to vector<8xf32>
    %200 = vector.shape_cast %199 : vector<8xf32> to vector<8x1xf32>
    %201 = vector.broadcast %200 : vector<8x1xf32> to vector<8x256xf32>
    %202 = arith.cmpf oeq, %198, %201 : vector<8x256xf32>
    %203 = vector.broadcast %c-1_i32 : i32 to vector<8x256xi32>
    %204 = arith.select %202, %1, %203 : vector<8x256xi1>, vector<8x256xi32>
    %cst_45 = arith.constant dense<-2147483648> : vector<8xi32>
    %205 = vector.multi_reduction <maxsi>, %204, %cst_45 [1] : vector<8x256xi32> to vector<8xi32>
    %206 = vector.shape_cast %205 : vector<8xi32> to vector<8x1xi32>
    %207 = vector.broadcast %206 : vector<8x1xi32> to vector<8x256xi32>
    %208 = arith.cmpi eq, %1, %207 : vector<8x256xi32>
    %c1_i32_46 = arith.constant 1 : i32
    %209 = vector.broadcast %c1_i32_46 : i32 to vector<8x256xi32>
    %210 = arith.select %208, %209, %196 : vector<8x256xi1>, vector<8x256xi32>
    %211 = vector.broadcast %cst : f32 to vector<8x256xf32>
    %212 = arith.select %208, %211, %198 : vector<8x256xi1>, vector<8x256xf32>
    %c15_i32 = arith.constant 15 : i32
    %cst_47 = arith.constant dense<0xFF800000> : vector<8xf32>
    %213 = vector.multi_reduction <maximumf>, %212, %cst_47 [1] : vector<8x256xf32> to vector<8xf32>
    %214 = vector.shape_cast %213 : vector<8xf32> to vector<8x1xf32>
    %215 = vector.broadcast %214 : vector<8x1xf32> to vector<8x256xf32>
    %216 = arith.cmpf oeq, %212, %215 : vector<8x256xf32>
    %217 = vector.broadcast %c-1_i32 : i32 to vector<8x256xi32>
    %218 = arith.select %216, %1, %217 : vector<8x256xi1>, vector<8x256xi32>
    %cst_48 = arith.constant dense<-2147483648> : vector<8xi32>
    %219 = vector.multi_reduction <maxsi>, %218, %cst_48 [1] : vector<8x256xi32> to vector<8xi32>
    %220 = vector.shape_cast %219 : vector<8xi32> to vector<8x1xi32>
    %221 = vector.broadcast %220 : vector<8x1xi32> to vector<8x256xi32>
    %222 = arith.cmpi eq, %1, %221 : vector<8x256xi32>
    %c1_i32_49 = arith.constant 1 : i32
    %223 = vector.broadcast %c1_i32_49 : i32 to vector<8x256xi32>
    %224 = arith.select %222, %223, %210 : vector<8x256xi1>, vector<8x256xi32>
    %225 = vector.broadcast %cst : f32 to vector<8x256xf32>
    %226 = arith.select %222, %225, %212 : vector<8x256xi1>, vector<8x256xf32>
    %c16_i32 = arith.constant 16 : i32
    %cst_50 = arith.constant dense<0xFF800000> : vector<8xf32>
    %227 = vector.multi_reduction <maximumf>, %226, %cst_50 [1] : vector<8x256xf32> to vector<8xf32>
    %228 = vector.shape_cast %227 : vector<8xf32> to vector<8x1xf32>
    %229 = vector.broadcast %228 : vector<8x1xf32> to vector<8x256xf32>
    %230 = arith.cmpf oeq, %226, %229 : vector<8x256xf32>
    %231 = vector.broadcast %c-1_i32 : i32 to vector<8x256xi32>
    %232 = arith.select %230, %1, %231 : vector<8x256xi1>, vector<8x256xi32>
    %cst_51 = arith.constant dense<-2147483648> : vector<8xi32>
    %233 = vector.multi_reduction <maxsi>, %232, %cst_51 [1] : vector<8x256xi32> to vector<8xi32>
    %234 = vector.shape_cast %233 : vector<8xi32> to vector<8x1xi32>
    %235 = vector.broadcast %234 : vector<8x1xi32> to vector<8x256xi32>
    %236 = arith.cmpi eq, %1, %235 : vector<8x256xi32>
    %c1_i32_52 = arith.constant 1 : i32
    %237 = vector.broadcast %c1_i32_52 : i32 to vector<8x256xi32>
    %238 = arith.select %236, %237, %224 : vector<8x256xi1>, vector<8x256xi32>
    %239 = vector.broadcast %cst : f32 to vector<8x256xf32>
    %240 = arith.select %236, %239, %226 : vector<8x256xi1>, vector<8x256xf32>
    %c17_i32 = arith.constant 17 : i32
    %cst_53 = arith.constant dense<0xFF800000> : vector<8xf32>
    %241 = vector.multi_reduction <maximumf>, %240, %cst_53 [1] : vector<8x256xf32> to vector<8xf32>
    %242 = vector.shape_cast %241 : vector<8xf32> to vector<8x1xf32>
    %243 = vector.broadcast %242 : vector<8x1xf32> to vector<8x256xf32>
    %244 = arith.cmpf oeq, %240, %243 : vector<8x256xf32>
    %245 = vector.broadcast %c-1_i32 : i32 to vector<8x256xi32>
    %246 = arith.select %244, %1, %245 : vector<8x256xi1>, vector<8x256xi32>
    %cst_54 = arith.constant dense<-2147483648> : vector<8xi32>
    %247 = vector.multi_reduction <maxsi>, %246, %cst_54 [1] : vector<8x256xi32> to vector<8xi32>
    %248 = vector.shape_cast %247 : vector<8xi32> to vector<8x1xi32>
    %249 = vector.broadcast %248 : vector<8x1xi32> to vector<8x256xi32>
    %250 = arith.cmpi eq, %1, %249 : vector<8x256xi32>
    %c1_i32_55 = arith.constant 1 : i32
    %251 = vector.broadcast %c1_i32_55 : i32 to vector<8x256xi32>
    %252 = arith.select %250, %251, %238 : vector<8x256xi1>, vector<8x256xi32>
    %253 = vector.broadcast %cst : f32 to vector<8x256xf32>
    %254 = arith.select %250, %253, %240 : vector<8x256xi1>, vector<8x256xf32>
    %c18_i32 = arith.constant 18 : i32
    %cst_56 = arith.constant dense<0xFF800000> : vector<8xf32>
    %255 = vector.multi_reduction <maximumf>, %254, %cst_56 [1] : vector<8x256xf32> to vector<8xf32>
    %256 = vector.shape_cast %255 : vector<8xf32> to vector<8x1xf32>
    %257 = vector.broadcast %256 : vector<8x1xf32> to vector<8x256xf32>
    %258 = arith.cmpf oeq, %254, %257 : vector<8x256xf32>
    %259 = vector.broadcast %c-1_i32 : i32 to vector<8x256xi32>
    %260 = arith.select %258, %1, %259 : vector<8x256xi1>, vector<8x256xi32>
    %cst_57 = arith.constant dense<-2147483648> : vector<8xi32>
    %261 = vector.multi_reduction <maxsi>, %260, %cst_57 [1] : vector<8x256xi32> to vector<8xi32>
    %262 = vector.shape_cast %261 : vector<8xi32> to vector<8x1xi32>
    %263 = vector.broadcast %262 : vector<8x1xi32> to vector<8x256xi32>
    %264 = arith.cmpi eq, %1, %263 : vector<8x256xi32>
    %c1_i32_58 = arith.constant 1 : i32
    %265 = vector.broadcast %c1_i32_58 : i32 to vector<8x256xi32>
    %266 = arith.select %264, %265, %252 : vector<8x256xi1>, vector<8x256xi32>
    %267 = vector.broadcast %cst : f32 to vector<8x256xf32>
    %268 = arith.select %264, %267, %254 : vector<8x256xi1>, vector<8x256xf32>
    %c19_i32 = arith.constant 19 : i32
    %cst_59 = arith.constant dense<0xFF800000> : vector<8xf32>
    %269 = vector.multi_reduction <maximumf>, %268, %cst_59 [1] : vector<8x256xf32> to vector<8xf32>
    %270 = vector.shape_cast %269 : vector<8xf32> to vector<8x1xf32>
    %271 = vector.broadcast %270 : vector<8x1xf32> to vector<8x256xf32>
    %272 = arith.cmpf oeq, %268, %271 : vector<8x256xf32>
    %273 = vector.broadcast %c-1_i32 : i32 to vector<8x256xi32>
    %274 = arith.select %272, %1, %273 : vector<8x256xi1>, vector<8x256xi32>
    %cst_60 = arith.constant dense<-2147483648> : vector<8xi32>
    %275 = vector.multi_reduction <maxsi>, %274, %cst_60 [1] : vector<8x256xi32> to vector<8xi32>
    %276 = vector.shape_cast %275 : vector<8xi32> to vector<8x1xi32>
    %277 = vector.broadcast %276 : vector<8x1xi32> to vector<8x256xi32>
    %278 = arith.cmpi eq, %1, %277 : vector<8x256xi32>
    %c1_i32_61 = arith.constant 1 : i32
    %279 = vector.broadcast %c1_i32_61 : i32 to vector<8x256xi32>
    %280 = arith.select %278, %279, %266 : vector<8x256xi1>, vector<8x256xi32>
    %281 = vector.broadcast %cst : f32 to vector<8x256xf32>
    %282 = arith.select %278, %281, %268 : vector<8x256xi1>, vector<8x256xf32>
    %c0_i32_62 = arith.constant 0 : i32
    %283 = vector.broadcast %c0_i32_62 : i32 to vector<8x256xi32>
    %c256_i32 = arith.constant 256 : i32
    %cst_63 = arith.constant 0x7F800000 : f32
    %c0_i32_64 = arith.constant 0 : i32
    %cst_65 = arith.constant dense<0x7F800000> : vector<8xf32>
    %284 = vector.multi_reduction <minimumf>, %0, %cst_65 [1] : vector<8x256xf32> to vector<8xf32>
    %285 = vector.shape_cast %284 : vector<8xf32> to vector<8x1xf32>
    %286 = vector.broadcast %285 : vector<8x1xf32> to vector<8x256xf32>
    %287 = arith.cmpf oeq, %0, %286 : vector<8x256xf32>
    %288 = vector.broadcast %c256_i32 : i32 to vector<8x256xi32>
    %289 = arith.select %287, %1, %288 : vector<8x256xi1>, vector<8x256xi32>
    %cst_66 = arith.constant dense<2147483647> : vector<8xi32>
    %290 = vector.multi_reduction <minsi>, %289, %cst_66 [1] : vector<8x256xi32> to vector<8xi32>
    %291 = vector.shape_cast %290 : vector<8xi32> to vector<8x1xi32>
    %292 = vector.broadcast %291 : vector<8x1xi32> to vector<8x256xi32>
    %293 = arith.cmpi eq, %1, %292 : vector<8x256xi32>
    %c1_i32_67 = arith.constant 1 : i32
    %294 = vector.broadcast %c1_i32_67 : i32 to vector<8x256xi32>
    %295 = arith.select %293, %294, %283 : vector<8x256xi1>, vector<8x256xi32>
    %296 = vector.broadcast %cst_63 : f32 to vector<8x256xf32>
    %297 = arith.select %293, %296, %0 : vector<8x256xi1>, vector<8x256xf32>
    %c1_i32_68 = arith.constant 1 : i32
    %cst_69 = arith.constant dense<0x7F800000> : vector<8xf32>
    %298 = vector.multi_reduction <minimumf>, %297, %cst_69 [1] : vector<8x256xf32> to vector<8xf32>
    %299 = vector.shape_cast %298 : vector<8xf32> to vector<8x1xf32>
    %300 = vector.broadcast %299 : vector<8x1xf32> to vector<8x256xf32>
    %301 = arith.cmpf oeq, %297, %300 : vector<8x256xf32>
    %302 = vector.broadcast %c256_i32 : i32 to vector<8x256xi32>
    %303 = arith.select %301, %1, %302 : vector<8x256xi1>, vector<8x256xi32>
    %cst_70 = arith.constant dense<2147483647> : vector<8xi32>
    %304 = vector.multi_reduction <minsi>, %303, %cst_70 [1] : vector<8x256xi32> to vector<8xi32>
    %305 = vector.shape_cast %304 : vector<8xi32> to vector<8x1xi32>
    %306 = vector.broadcast %305 : vector<8x1xi32> to vector<8x256xi32>
    %307 = arith.cmpi eq, %1, %306 : vector<8x256xi32>
    %c1_i32_71 = arith.constant 1 : i32
    %308 = vector.broadcast %c1_i32_71 : i32 to vector<8x256xi32>
    %309 = arith.select %307, %308, %295 : vector<8x256xi1>, vector<8x256xi32>
    %310 = vector.broadcast %cst_63 : f32 to vector<8x256xf32>
    %311 = arith.select %307, %310, %297 : vector<8x256xi1>, vector<8x256xf32>
    %c2_i32_72 = arith.constant 2 : i32
    %cst_73 = arith.constant dense<0x7F800000> : vector<8xf32>
    %312 = vector.multi_reduction <minimumf>, %311, %cst_73 [1] : vector<8x256xf32> to vector<8xf32>
    %313 = vector.shape_cast %312 : vector<8xf32> to vector<8x1xf32>
    %314 = vector.broadcast %313 : vector<8x1xf32> to vector<8x256xf32>
    %315 = arith.cmpf oeq, %311, %314 : vector<8x256xf32>
    %316 = vector.broadcast %c256_i32 : i32 to vector<8x256xi32>
    %317 = arith.select %315, %1, %316 : vector<8x256xi1>, vector<8x256xi32>
    %cst_74 = arith.constant dense<2147483647> : vector<8xi32>
    %318 = vector.multi_reduction <minsi>, %317, %cst_74 [1] : vector<8x256xi32> to vector<8xi32>
    %319 = vector.shape_cast %318 : vector<8xi32> to vector<8x1xi32>
    %320 = vector.broadcast %319 : vector<8x1xi32> to vector<8x256xi32>
    %321 = arith.cmpi eq, %1, %320 : vector<8x256xi32>
    %c1_i32_75 = arith.constant 1 : i32
    %322 = vector.broadcast %c1_i32_75 : i32 to vector<8x256xi32>
    %323 = arith.select %321, %322, %309 : vector<8x256xi1>, vector<8x256xi32>
    %324 = vector.broadcast %cst_63 : f32 to vector<8x256xf32>
    %325 = arith.select %321, %324, %311 : vector<8x256xi1>, vector<8x256xf32>
    %c3_i32_76 = arith.constant 3 : i32
    %cst_77 = arith.constant dense<0x7F800000> : vector<8xf32>
    %326 = vector.multi_reduction <minimumf>, %325, %cst_77 [1] : vector<8x256xf32> to vector<8xf32>
    %327 = vector.shape_cast %326 : vector<8xf32> to vector<8x1xf32>
    %328 = vector.broadcast %327 : vector<8x1xf32> to vector<8x256xf32>
    %329 = arith.cmpf oeq, %325, %328 : vector<8x256xf32>
    %330 = vector.broadcast %c256_i32 : i32 to vector<8x256xi32>
    %331 = arith.select %329, %1, %330 : vector<8x256xi1>, vector<8x256xi32>
    %cst_78 = arith.constant dense<2147483647> : vector<8xi32>
    %332 = vector.multi_reduction <minsi>, %331, %cst_78 [1] : vector<8x256xi32> to vector<8xi32>
    %333 = vector.shape_cast %332 : vector<8xi32> to vector<8x1xi32>
    %334 = vector.broadcast %333 : vector<8x1xi32> to vector<8x256xi32>
    %335 = arith.cmpi eq, %1, %334 : vector<8x256xi32>
    %c1_i32_79 = arith.constant 1 : i32
    %336 = vector.broadcast %c1_i32_79 : i32 to vector<8x256xi32>
    %337 = arith.select %335, %336, %323 : vector<8x256xi1>, vector<8x256xi32>
    %338 = vector.broadcast %cst_63 : f32 to vector<8x256xf32>
    %339 = arith.select %335, %338, %325 : vector<8x256xi1>, vector<8x256xf32>
    %c4_i32_80 = arith.constant 4 : i32
    %cst_81 = arith.constant dense<0x7F800000> : vector<8xf32>
    %340 = vector.multi_reduction <minimumf>, %339, %cst_81 [1] : vector<8x256xf32> to vector<8xf32>
    %341 = vector.shape_cast %340 : vector<8xf32> to vector<8x1xf32>
    %342 = vector.broadcast %341 : vector<8x1xf32> to vector<8x256xf32>
    %343 = arith.cmpf oeq, %339, %342 : vector<8x256xf32>
    %344 = vector.broadcast %c256_i32 : i32 to vector<8x256xi32>
    %345 = arith.select %343, %1, %344 : vector<8x256xi1>, vector<8x256xi32>
    %cst_82 = arith.constant dense<2147483647> : vector<8xi32>
    %346 = vector.multi_reduction <minsi>, %345, %cst_82 [1] : vector<8x256xi32> to vector<8xi32>
    %347 = vector.shape_cast %346 : vector<8xi32> to vector<8x1xi32>
    %348 = vector.broadcast %347 : vector<8x1xi32> to vector<8x256xi32>
    %349 = arith.cmpi eq, %1, %348 : vector<8x256xi32>
    %c1_i32_83 = arith.constant 1 : i32
    %350 = vector.broadcast %c1_i32_83 : i32 to vector<8x256xi32>
    %351 = arith.select %349, %350, %337 : vector<8x256xi1>, vector<8x256xi32>
    %352 = vector.broadcast %cst_63 : f32 to vector<8x256xf32>
    %353 = arith.select %349, %352, %339 : vector<8x256xi1>, vector<8x256xf32>
    %c5_i32_84 = arith.constant 5 : i32
    %cst_85 = arith.constant dense<0x7F800000> : vector<8xf32>
    %354 = vector.multi_reduction <minimumf>, %353, %cst_85 [1] : vector<8x256xf32> to vector<8xf32>
    %355 = vector.shape_cast %354 : vector<8xf32> to vector<8x1xf32>
    %356 = vector.broadcast %355 : vector<8x1xf32> to vector<8x256xf32>
    %357 = arith.cmpf oeq, %353, %356 : vector<8x256xf32>
    %358 = vector.broadcast %c256_i32 : i32 to vector<8x256xi32>
    %359 = arith.select %357, %1, %358 : vector<8x256xi1>, vector<8x256xi32>
    %cst_86 = arith.constant dense<2147483647> : vector<8xi32>
    %360 = vector.multi_reduction <minsi>, %359, %cst_86 [1] : vector<8x256xi32> to vector<8xi32>
    %361 = vector.shape_cast %360 : vector<8xi32> to vector<8x1xi32>
    %362 = vector.broadcast %361 : vector<8x1xi32> to vector<8x256xi32>
    %363 = arith.cmpi eq, %1, %362 : vector<8x256xi32>
    %c1_i32_87 = arith.constant 1 : i32
    %364 = vector.broadcast %c1_i32_87 : i32 to vector<8x256xi32>
    %365 = arith.select %363, %364, %351 : vector<8x256xi1>, vector<8x256xi32>
    %366 = vector.broadcast %cst_63 : f32 to vector<8x256xf32>
    %367 = arith.select %363, %366, %353 : vector<8x256xi1>, vector<8x256xf32>
    %c6_i32_88 = arith.constant 6 : i32
    %cst_89 = arith.constant dense<0x7F800000> : vector<8xf32>
    %368 = vector.multi_reduction <minimumf>, %367, %cst_89 [1] : vector<8x256xf32> to vector<8xf32>
    %369 = vector.shape_cast %368 : vector<8xf32> to vector<8x1xf32>
    %370 = vector.broadcast %369 : vector<8x1xf32> to vector<8x256xf32>
    %371 = arith.cmpf oeq, %367, %370 : vector<8x256xf32>
    %372 = vector.broadcast %c256_i32 : i32 to vector<8x256xi32>
    %373 = arith.select %371, %1, %372 : vector<8x256xi1>, vector<8x256xi32>
    %cst_90 = arith.constant dense<2147483647> : vector<8xi32>
    %374 = vector.multi_reduction <minsi>, %373, %cst_90 [1] : vector<8x256xi32> to vector<8xi32>
    %375 = vector.shape_cast %374 : vector<8xi32> to vector<8x1xi32>
    %376 = vector.broadcast %375 : vector<8x1xi32> to vector<8x256xi32>
    %377 = arith.cmpi eq, %1, %376 : vector<8x256xi32>
    %c1_i32_91 = arith.constant 1 : i32
    %378 = vector.broadcast %c1_i32_91 : i32 to vector<8x256xi32>
    %379 = arith.select %377, %378, %365 : vector<8x256xi1>, vector<8x256xi32>
    %380 = vector.broadcast %cst_63 : f32 to vector<8x256xf32>
    %381 = arith.select %377, %380, %367 : vector<8x256xi1>, vector<8x256xf32>
    %c7_i32_92 = arith.constant 7 : i32
    %cst_93 = arith.constant dense<0x7F800000> : vector<8xf32>
    %382 = vector.multi_reduction <minimumf>, %381, %cst_93 [1] : vector<8x256xf32> to vector<8xf32>
    %383 = vector.shape_cast %382 : vector<8xf32> to vector<8x1xf32>
    %384 = vector.broadcast %383 : vector<8x1xf32> to vector<8x256xf32>
    %385 = arith.cmpf oeq, %381, %384 : vector<8x256xf32>
    %386 = vector.broadcast %c256_i32 : i32 to vector<8x256xi32>
    %387 = arith.select %385, %1, %386 : vector<8x256xi1>, vector<8x256xi32>
    %cst_94 = arith.constant dense<2147483647> : vector<8xi32>
    %388 = vector.multi_reduction <minsi>, %387, %cst_94 [1] : vector<8x256xi32> to vector<8xi32>
    %389 = vector.shape_cast %388 : vector<8xi32> to vector<8x1xi32>
    %390 = vector.broadcast %389 : vector<8x1xi32> to vector<8x256xi32>
    %391 = arith.cmpi eq, %1, %390 : vector<8x256xi32>
    %c1_i32_95 = arith.constant 1 : i32
    %392 = vector.broadcast %c1_i32_95 : i32 to vector<8x256xi32>
    %393 = arith.select %391, %392, %379 : vector<8x256xi1>, vector<8x256xi32>
    %394 = vector.broadcast %cst_63 : f32 to vector<8x256xf32>
    %395 = arith.select %391, %394, %381 : vector<8x256xi1>, vector<8x256xf32>
    %c8_i32_96 = arith.constant 8 : i32
    %cst_97 = arith.constant dense<0x7F800000> : vector<8xf32>
    %396 = vector.multi_reduction <minimumf>, %395, %cst_97 [1] : vector<8x256xf32> to vector<8xf32>
    %397 = vector.shape_cast %396 : vector<8xf32> to vector<8x1xf32>
    %398 = vector.broadcast %397 : vector<8x1xf32> to vector<8x256xf32>
    %399 = arith.cmpf oeq, %395, %398 : vector<8x256xf32>
    %400 = vector.broadcast %c256_i32 : i32 to vector<8x256xi32>
    %401 = arith.select %399, %1, %400 : vector<8x256xi1>, vector<8x256xi32>
    %cst_98 = arith.constant dense<2147483647> : vector<8xi32>
    %402 = vector.multi_reduction <minsi>, %401, %cst_98 [1] : vector<8x256xi32> to vector<8xi32>
    %403 = vector.shape_cast %402 : vector<8xi32> to vector<8x1xi32>
    %404 = vector.broadcast %403 : vector<8x1xi32> to vector<8x256xi32>
    %405 = arith.cmpi eq, %1, %404 : vector<8x256xi32>
    %c1_i32_99 = arith.constant 1 : i32
    %406 = vector.broadcast %c1_i32_99 : i32 to vector<8x256xi32>
    %407 = arith.select %405, %406, %393 : vector<8x256xi1>, vector<8x256xi32>
    %408 = vector.broadcast %cst_63 : f32 to vector<8x256xf32>
    %409 = arith.select %405, %408, %395 : vector<8x256xi1>, vector<8x256xf32>
    %c9_i32_100 = arith.constant 9 : i32
    %cst_101 = arith.constant dense<0x7F800000> : vector<8xf32>
    %410 = vector.multi_reduction <minimumf>, %409, %cst_101 [1] : vector<8x256xf32> to vector<8xf32>
    %411 = vector.shape_cast %410 : vector<8xf32> to vector<8x1xf32>
    %412 = vector.broadcast %411 : vector<8x1xf32> to vector<8x256xf32>
    %413 = arith.cmpf oeq, %409, %412 : vector<8x256xf32>
    %414 = vector.broadcast %c256_i32 : i32 to vector<8x256xi32>
    %415 = arith.select %413, %1, %414 : vector<8x256xi1>, vector<8x256xi32>
    %cst_102 = arith.constant dense<2147483647> : vector<8xi32>
    %416 = vector.multi_reduction <minsi>, %415, %cst_102 [1] : vector<8x256xi32> to vector<8xi32>
    %417 = vector.shape_cast %416 : vector<8xi32> to vector<8x1xi32>
    %418 = vector.broadcast %417 : vector<8x1xi32> to vector<8x256xi32>
    %419 = arith.cmpi eq, %1, %418 : vector<8x256xi32>
    %c1_i32_103 = arith.constant 1 : i32
    %420 = vector.broadcast %c1_i32_103 : i32 to vector<8x256xi32>
    %421 = arith.select %419, %420, %407 : vector<8x256xi1>, vector<8x256xi32>
    %422 = vector.broadcast %cst_63 : f32 to vector<8x256xf32>
    %423 = arith.select %419, %422, %409 : vector<8x256xi1>, vector<8x256xf32>
    %c1_i32_104 = arith.constant 1 : i32
    %424 = vector.broadcast %c1_i32_104 : i32 to vector<8x256xi32>
    %425 = arith.cmpi eq, %280, %424 : vector<8x256xi32>
    %c0_i32_105 = arith.constant 0 : i32
    %426 = vector.broadcast %c0_i32_105 : i32 to vector<8x256xi32>
    %427 = arith.cmpi eq, %421, %426 : vector<8x256xi32>
    %428 = arith.andi %425, %427 : vector<8x256xi1>
    %c1_i32_106 = arith.constant 1 : i32
    %429 = vector.broadcast %c1_i32_106 : i32 to vector<8x256xi32>
    %430 = arith.cmpi eq, %421, %429 : vector<8x256xi32>
    %c0_i32_107 = arith.constant 0 : i32
    %431 = vector.broadcast %c0_i32_107 : i32 to vector<8x256xi32>
    %432 = arith.cmpi eq, %280, %431 : vector<8x256xi32>
    %433 = arith.andi %430, %432 : vector<8x256xi1>
    %c-255_i32 = arith.constant -255 : i32
    %434 = vector.broadcast %c-255_i32 : i32 to vector<8x256xi32>
    %c1_i32_108 = arith.constant 1 : i32
    %435 = vector.broadcast %c1_i32_108 : i32 to vector<8x256xi32>
    %436 = arith.select %428, %435, %434 : vector<8x256xi1>, vector<8x256xi32>
    %c0_i32_109 = arith.constant 0 : i32
    %437 = vector.broadcast %c0_i32_109 : i32 to vector<8x256xi32>
    %438 = arith.select %433, %437, %436 : vector<8x256xi1>, vector<8x256xi32>
    %c0_110 = arith.constant 0 : index
    %c0_111 = arith.constant 0 : index
    %439 = vector.load %arg2[%c0_110, %c0_111] : memref<8x256xi32, #tpu.memory_space<vmem>>, vector<8x256xi32>
    tpu.vector_store %arg2[%c0_110, %c0_111], %438 {strides = array<i32>} : memref<8x256xi32, #tpu.memory_space<vmem>>, vector<8x256xi32>,
    return
  }
  func.func @transform_0(%arg0: i32) -> (i32, i32) {
    %c0_i32 = arith.constant 0 : i32
    %c0_i32_0 = arith.constant 0 : i32
    return %arg0, %c0_i32 : i32, i32
  }
  func.func @transform_1(%arg0: i32) -> (i32, i32) {
    %c0_i32 = arith.constant 0 : i32
    %c0_i32_0 = arith.constant 0 : i32
    return %arg0, %c0_i32 : i32, i32
  }
}

</mosaic_0001>

<bundles_post_ra>
// kernel: tpu_custom_call.1
= control target key start
LH: loop header
LB: loop body
LE: loop exit
PB: predicated region body
PF: predicated region fallthrough
CT: control target
= control target key end

     0   :  { %6 = vsyncpa [#allocation3], 0  ;;  %s1163_s0 = inlined_call_operand.hbm [shape: f32[8,256], index: 0, kind: input, shape index: {}]   ;;  %s1164_s1 = inlined_call_operand.hbm [shape: s32[8,256], index: 1, kind: output, shape index: {}]  }
   0x1   :  { %7 = vsyncpa [#allocation4], 0  ;;  %s973_s6 = smov [#allocation2]  }
   0x2   :  { %s14_s7 = sshll.u32 %s973_s6, 4  ;;  %s15_s7 = int_to_ptr.vmem [resolvable:$true] %s14_s7 }
   0x3   :  { %s937_s8 = scalar_lea.vmem %s15_s7, 256  ;;  %p942_p1 = scmp.lt.s32.totalorder %s15_s7, %s15_s7 }
   0x4   :  { %p938_p0 = scmp.ne.s32.totalorder %s15_s7, %s937_s8  ;;  %p943_p2 = scmp.lt.s32.totalorder %s937_s8, %s937_s8 }
   0x6   :  { %p944_p3 = por %p943_p2, %p942_p1 }
   0x8   :  { %p945_p4 = pnand %p944_p3, %p938_p0 }
   0xa   :  { %948 = shalt.err (!%p945_p4)
}
   0xb   :  { %17 = dma.hbm_to_vmem [thread:$0]  %s1163_s0, 256, %s15_s7, [#allocation3]  }
   0xc   :  { %969 = dma.done.wait [#allocation3], 256  }
   0xd   :  { %970 = vsyncadd [#allocation3], 4294967040  ;;  %v990_v0 = vld [vmem:[#allocation2] sm:$0xff]  ;;  %v992_v1 = vld [vmem:[#allocation2 + $0x8] sm:$0xff]  ;;  %v23_v3 = vlaneseq  ;;  %v974_v39 = vmov 0   ;;  %s975_s0 = smov [#allocation5]  }
   0xe   :  { %v26_v2 = vmax.f32 %v990_v0, %v992_v1  ;;  %s916_s11 = sshll.u32 %s975_s0, 4  ;;  %s917_s11 = int_to_ptr.vmem [resolvable:$true] %s916_s11 }
   0xf   :  { %v996_v4 = vand.u32 127, %v23_v3  ;;  %s949_s12 = scalar_lea.vmem %s917_s11, 256  ;;  %p954_p6 = scmp.lt.s32.totalorder %s917_s11, %s917_s11 }
  0x10   :  { %27 = vmax.xlane.f32.xlu0 %v26_v2  ;;  %p950_p5 = scmp.ne.s32.totalorder %s917_s11, %s949_s12  ;;  %p955_p7 = scmp.lt.s32.totalorder %s949_s12, %s949_s12 }
  0x11   :  { %v999_v5 = vadd.s32 128, %v996_v4 }
  0x12   :  { %p956_p8 = por %p955_p7, %p954_p6 }
  0x14   :  { %p957_p9 = pnand %p956_p8, %p950_p5 }
  0x99   :  { %v28_v6 = vpop.xlane.xlu0 %27 }
  0x9a   :  { %vm29_vm0 = vcmp.eq.f32.partialorder %v990_v0, %v28_v6  ;;  %vm30_vm1 = vcmp.eq.f32.partialorder %v992_v1, %v28_v6 }
  0x9b   :  { %v31_v7 = vsel %vm29_vm0, %v996_v4, 4294967295  ;;  %v32_v8 = vsel %vm30_vm1, %v999_v5, 4294967295 }
  0x9c   :  { %vm33_vm2 = vcmp.gt.s32.totalorder %v31_v7, %v32_v8 }
  0x9d   :  { %v34_v9 = vsel %vm33_vm2, %v31_v7, %v32_v8 }
  0x9e   :  { %v36_v10 = vshra.s32 %v34_v9, 16  ;;  %v35_v12 = vand.u32 65535, %v34_v9 }
  0xa0   :  { %v38_v11 = vcvt.s32.f32 %v36_v10  ;;  %v37_v14 = vcvt.s32.f32 %v35_v12 }
  0xa2   :  { %39 = vmax.xlane.f32.xlu0 %v38_v11 }
 0x12b   :  { %v40_v13 = vpop.xlane.xlu0 %39 }
 0x12c   :  { %vm41_vm3 = vcmp.eq.f32.partialorder %v38_v11, %v40_v13  ;;  %v46_v16 = vcvt.f32.s32 %v40_v13 }
 0x12d   :  { %v42_v15 = vsel %vm41_vm3, %v37_v14, -inf }
 0x12e   :  { %43 = vmax.xlane.f32.xlu1 %v42_v15  ;;  %v47_v18 = vshll.u32 %v46_v16, 16 }
 0x1b7   :  { %v44_v17 = vpop.xlane.xlu1 %43 }
 0x1b8   :  { %v45_v19 = vcvt.f32.s32 %v44_v17 }
 0x1ba   :  { %v48_v20 = vadd.s32 %v47_v18, %v45_v19 }
 0x1bc   :  { %vm49_vm4 = vcmp.eq.s32.totalorder %v996_v4, %v48_v20  ;;  %vm50_vm5 = vcmp.eq.s32.totalorder %v999_v5, %v48_v20 }
 0x1bd   :  { %v53_v21 = vsel %vm49_vm4, -inf, %v990_v0  ;;  %v54_v22 = vsel %vm50_vm5, -inf, %v992_v1  ;;  %v51_v40 = vsel %vm49_vm4, 1, %v974_v39  ;;  %v52_v41 = vsel %vm50_vm5, 1, %v974_v39 }
 0x1be   :  { %v55_v23 = vmax.f32 %v53_v21, %v54_v22 }
 0x1c0   :  { %56 = vmax.xlane.f32.xlu1 %v55_v23 }
 0x249   :  { %v57_v24 = vpop.xlane.xlu1 %56 }
 0x24a   :  { %vm58_vm6 = vcmp.eq.f32.partialorder %v53_v21, %v57_v24  ;;  %vm59_vm7 = vcmp.eq.f32.partialorder %v54_v22, %v57_v24 }
 0x24b   :  { %v60_v25 = vsel %vm58_vm6, %v996_v4, 4294967295  ;;  %v61_v26 = vsel %vm59_vm7, %v999_v5, 4294967295 }
 0x24c   :  { %vm62_vm8 = vcmp.gt.s32.totalorder %v60_v25, %v61_v26 }
 0x24d   :  { %v63_v27 = vsel %vm62_vm8, %v60_v25, %v61_v26 }
 0x24e   :  { %v65_v28 = vshra.s32 %v63_v27, 16  ;;  %v64_v30 = vand.u32 65535, %v63_v27 }
 0x250   :  { %v67_v29 = vcvt.s32.f32 %v65_v28  ;;  %v66_v32 = vcvt.s32.f32 %v64_v30 }
 0x252   :  { %68 = vmax.xlane.f32.xlu0 %v67_v29 }
 0x2db   :  { %v69_v31 = vpop.xlane.xlu0 %68 }
 0x2dc   :  { %vm70_vm9 = vcmp.eq.f32.partialorder %v67_v29, %v69_v31  ;;  %v75_v34 = vcvt.f32.s32 %v69_v31 }
 0x2dd   :  { %v71_v33 = vsel %vm70_vm9, %v66_v32, -inf }
 0x2de   :  { %72 = vmax.xlane.f32.xlu1 %v71_v33  ;;  %v76_v36 = vshll.u32 %v75_v34, 16 }
 0x367   :  { %v73_v35 = vpop.xlane.xlu1 %72 }
 0x368   :  { %v74_v37 = vcvt.f32.s32 %v73_v35 }
 0x36a   :  { %v77_v38 = vadd.s32 %v76_v36, %v74_v37 }
 0x36c   :  { %vm78_vm10 = vcmp.eq.s32.totalorder %v996_v4, %v77_v38  ;;  %vm79_vm11 = vcmp.eq.s32.totalorder %v999_v5, %v77_v38 }
 0x36d   :  { %v80_v42 = vsel %vm78_vm10, 1, %v51_v40  ;;  %v81_v43 = vsel %vm79_vm11, 1, %v52_v41  ;;  %v82_v44 = vsel %vm78_vm10, -inf, %v53_v21  ;;  %v83_v45 = vsel %vm79_vm11, -inf, %v54_v22 }
 0x36e   :  { %v84_v46 = vmax.f32 %v82_v44, %v83_v45 }
 0x370   :  { %85 = vmax.xlane.f32.xlu0 %v84_v46 }
 0x3f9   :  { %v86_v47 = vpop.xlane.xlu0 %85 }
 0x3fa   :  { %vm87_vm12 = vcmp.eq.f32.partialorder %v82_v44, %v86_v47  ;;  %vm88_vm13 = vcmp.eq.f32.partialorder %v83_v45, %v86_v47 }
 0x3fb   :  { %v89_v48 = vsel %vm87_vm12, %v996_v4, 4294967295  ;;  %v90_v49 = vsel %vm88_vm13, %v999_v5, 4294967295 }
 0x3fc   :  { %vm91_vm14 = vcmp.gt.s32.totalorder %v89_v48, %v90_v49 }
 0x3fd   :  { %v92_v50 = vsel %vm91_vm14, %v89_v48, %v90_v49 }
 0x3fe   :  { %v94_v51 = vshra.s32 %v92_v50, 16  ;;  %v93_v53 = vand.u32 65535, %v92_v50 }
 0x400   :  { %v96_v52 = vcvt.s32.f32 %v94_v51  ;;  %v95_v55 = vcvt.s32.f32 %v93_v53 }
 0x402   :  { %97 = vmax.xlane.f32.xlu1 %v96_v52 }
 0x48b   :  { %v98_v54 = vpop.xlane.xlu1 %97 }
 0x48c   :  { %vm99_vm15 = vcmp.eq.f32.partialorder %v96_v52, %v98_v54  ;;  %v104_v57 = vcvt.f32.s32 %v98_v54 }
 0x48d   :  { %v100_v56 = vsel %vm99_vm15, %v95_v55, -inf }
 0x48e   :  { %101 = vmax.xlane.f32.xlu0 %v100_v56  ;;  %v105_v59 = vshll.u32 %v104_v57, 16 }
 0x517   :  { %v102_v58 = vpop.xlane.xlu0 %101 }
 0x518   :  { %v103_v60 = vcvt.f32.s32 %v102_v58 }
 0x51a   :  { %v106_v61 = vadd.s32 %v105_v59, %v103_v60 }
 0x51c   :  { %vm107_vm0 = vcmp.eq.s32.totalorder %v996_v4, %v106_v61  ;;  %vm108_vm1 = vcmp.eq.s32.totalorder %v999_v5, %v106_v61 }
 0x51d   :  { %v109_v62 = vsel %vm107_vm0, 1, %v80_v42  ;;  %v110_v63 = vsel %vm108_vm1, 1, %v81_v43  ;;  %v111_v2 = vsel %vm107_vm0, -inf, %v82_v44  ;;  %v112_v3 = vsel %vm108_vm1, -inf, %v83_v45 }
 0x51e   :  { %v113_v6 = vmax.f32 %v111_v2, %v112_v3 }
 0x520   :  { %114 = vmax.xlane.f32.xlu1 %v113_v6 }
 0x5a9   :  { %v115_v7 = vpop.xlane.xlu1 %114 }
 0x5aa   :  { %vm116_vm2 = vcmp.eq.f32.partialorder %v111_v2, %v115_v7  ;;  %vm117_vm3 = vcmp.eq.f32.partialorder %v112_v3, %v115_v7 }
 0x5ab   :  { %v118_v8 = vsel %vm116_vm2, %v996_v4, 4294967295  ;;  %v119_v9 = vsel %vm117_vm3, %v999_v5, 4294967295 }
 0x5ac   :  { %vm120_vm4 = vcmp.gt.s32.totalorder %v118_v8, %v119_v9 }
 0x5ad   :  { %v121_v10 = vsel %vm120_vm4, %v118_v8, %v119_v9 }
 0x5ae   :  { %v123_v11 = vshra.s32 %v121_v10, 16  ;;  %v122_v13 = vand.u32 65535, %v121_v10 }
 0x5b0   :  { %v125_v12 = vcvt.s32.f32 %v123_v11  ;;  %v124_v15 = vcvt.s32.f32 %v122_v13 }
 0x5b2   :  { %126 = vmax.xlane.f32.xlu0 %v125_v12 }
 0x63b   :  { %v127_v14 = vpop.xlane.xlu0 %126 }
 0x63c   :  { %vm128_vm5 = vcmp.eq.f32.partialorder %v125_v12, %v127_v14  ;;  %v133_v17 = vcvt.f32.s32 %v127_v14 }
 0x63d   :  { %v129_v16 = vsel %vm128_vm5, %v124_v15, -inf }
 0x63e   :  { %130 = vmax.xlane.f32.xlu1 %v129_v16  ;;  %v134_v19 = vshll.u32 %v133_v17, 16 }
 0x6c7   :  { %v131_v18 = vpop.xlane.xlu1 %130 }
 0x6c8   :  { %v132_v20 = vcvt.f32.s32 %v131_v18 }
 0x6ca   :  { %v135_v21 = vadd.s32 %v134_v19, %v132_v20 }
 0x6cc   :  { %vm136_vm6 = vcmp.eq.s32.totalorder %v996_v4, %v135_v21  ;;  %vm137_vm7 = vcmp.eq.s32.totalorder %v999_v5, %v135_v21 }
 0x6cd   :  { %v138_v22 = vsel %vm136_vm6, 1, %v109_v62  ;;  %v139_v23 = vsel %vm137_vm7, 1, %v110_v63  ;;  %v140_v24 = vsel %vm136_vm6, -inf, %v111_v2  ;;  %v141_v25 = vsel %vm137_vm7, -inf, %v112_v3 }
 0x6ce   :  { %v142_v26 = vmax.f32 %v140_v24, %v141_v25 }
 0x6d0   :  { %143 = vmax.xlane.f32.xlu0 %v142_v26 }
 0x759   :  { %v144_v27 = vpop.xlane.xlu0 %143 }
 0x75a   :  { %vm145_vm8 = vcmp.eq.f32.partialorder %v140_v24, %v144_v27  ;;  %vm146_vm9 = vcmp.eq.f32.partialorder %v141_v25, %v144_v27 }
 0x75b   :  { %v147_v28 = vsel %vm145_vm8, %v996_v4, 4294967295  ;;  %v148_v29 = vsel %vm146_vm9, %v999_v5, 4294967295 }
 0x75c   :  { %vm149_vm10 = vcmp.gt.s32.totalorder %v147_v28, %v148_v29 }
 0x75d   :  { %v150_v30 = vsel %vm149_vm10, %v147_v28, %v148_v29 }
 0x75e   :  { %v152_v31 = vshra.s32 %v150_v30, 16  ;;  %v151_v33 = vand.u32 65535, %v150_v30 }
 0x760   :  { %v154_v32 = vcvt.s32.f32 %v152_v31  ;;  %v153_v35 = vcvt.s32.f32 %v151_v33 }
 0x762   :  { %155 = vmax.xlane.f32.xlu1 %v154_v32 }
 0x7eb   :  { %v156_v34 = vpop.xlane.xlu1 %155 }
 0x7ec   :  { %vm157_vm11 = vcmp.eq.f32.partialorder %v154_v32, %v156_v34  ;;  %v162_v37 = vcvt.f32.s32 %v156_v34 }
 0x7ed   :  { %v158_v36 = vsel %vm157_vm11, %v153_v35, -inf }
 0x7ee   :  { %159 = vmax.xlane.f32.xlu0 %v158_v36  ;;  %v163_v40 = vshll.u32 %v162_v37, 16 }
 0x877   :  { %v160_v38 = vpop.xlane.xlu0 %159 }
 0x878   :  { %v161_v41 = vcvt.f32.s32 %v160_v38 }
 0x87a   :  { %v164_v42 = vadd.s32 %v163_v40, %v161_v41 }
 0x87c   :  { %vm165_vm12 = vcmp.eq.s32.totalorder %v996_v4, %v164_v42  ;;  %vm166_vm13 = vcmp.eq.s32.totalorder %v999_v5, %v164_v42 }
 0x87d   :  { %v167_v43 = vsel %vm165_vm12, 1, %v138_v22  ;;  %v168_v44 = vsel %vm166_vm13, 1, %v139_v23  ;;  %v169_v45 = vsel %vm165_vm12, -inf, %v140_v24  ;;  %v170_v46 = vsel %vm166_vm13, -inf, %v141_v25 }
 0x87e   :  { %v171_v47 = vmax.f32 %v169_v45, %v170_v46 }
 0x880   :  { %172 = vmax.xlane.f32.xlu1 %v171_v47 }
 0x909   :  { %v173_v48 = vpop.xlane.xlu1 %172 }
 0x90a   :  { %vm174_vm14 = vcmp.eq.f32.partialorder %v169_v45, %v173_v48  ;;  %vm175_vm15 = vcmp.eq.f32.partialorder %v170_v46, %v173_v48 }
 0x90b   :  { %v176_v49 = vsel %vm174_vm14, %v996_v4, 4294967295  ;;  %v177_v50 = vsel %vm175_vm15, %v999_v5, 4294967295 }
 0x90c   :  { %vm178_vm0 = vcmp.gt.s32.totalorder %v176_v49, %v177_v50 }
 0x90d   :  { %v179_v51 = vsel %vm178_vm0, %v176_v49, %v177_v50 }
 0x90e   :  { %v181_v52 = vshra.s32 %v179_v51, 16  ;;  %v180_v54 = vand.u32 65535, %v179_v51 }
 0x910   :  { %v183_v53 = vcvt.s32.f32 %v181_v52  ;;  %v182_v56 = vcvt.s32.f32 %v180_v54 }
 0x912   :  { %184 = vmax.xlane.f32.xlu0 %v183_v53 }
 0x99b   :  { %v185_v55 = vpop.xlane.xlu0 %184 }
 0x99c   :  { %vm186_vm1 = vcmp.eq.f32.partialorder %v183_v53, %v185_v55  ;;  %v191_v58 = vcvt.f32.s32 %v185_v55 }
 0x99d   :  { %v187_v57 = vsel %vm186_vm1, %v182_v56, -inf }
 0x99e   :  { %188 = vmax.xlane.f32.xlu1 %v187_v57  ;;  %v192_v60 = vshll.u32 %v191_v58, 16 }
 0xa27   :  { %v189_v59 = vpop.xlane.xlu1 %188 }
 0xa28   :  { %v190_v61 = vcvt.f32.s32 %v189_v59 }
 0xa2a   :  { %v193_v62 = vadd.s32 %v192_v60, %v190_v61 }
 0xa2c   :  { %vm194_vm2 = vcmp.eq.s32.totalorder %v996_v4, %v193_v62  ;;  %vm195_vm3 = vcmp.eq.s32.totalorder %v999_v5, %v193_v62 }
 0xa2d   :  { %v196_v63 = vsel %vm194_vm2, 1, %v167_v43  ;;  %v197_v2 = vsel %vm195_vm3, 1, %v168_v44  ;;  %v198_v3 = vsel %vm194_vm2, -inf, %v169_v45  ;;  %v199_v6 = vsel %vm195_vm3, -inf, %v170_v46 }
 0xa2e   :  { %v200_v7 = vmax.f32 %v198_v3, %v199_v6 }
 0xa30   :  { %201 = vmax.xlane.f32.xlu0 %v200_v7 }
 0xab9   :  { %v202_v8 = vpop.xlane.xlu0 %201 }
 0xaba   :  { %vm203_vm4 = vcmp.eq.f32.partialorder %v198_v3, %v202_v8  ;;  %vm204_vm5 = vcmp.eq.f32.partialorder %v199_v6, %v202_v8 }
 0xabb   :  { %v205_v9 = vsel %vm203_vm4, %v996_v4, 4294967295  ;;  %v206_v10 = vsel %vm204_vm5, %v999_v5, 4294967295 }
 0xabc   :  { %vm207_vm6 = vcmp.gt.s32.totalorder %v205_v9, %v206_v10 }
 0xabd   :  { %v208_v11 = vsel %vm207_vm6, %v205_v9, %v206_v10 }
 0xabe   :  { %v210_v12 = vshra.s32 %v208_v11, 16  ;;  %v209_v14 = vand.u32 65535, %v208_v11 }
 0xac0   :  { %v212_v13 = vcvt.s32.f32 %v210_v12  ;;  %v211_v16 = vcvt.s32.f32 %v209_v14 }
 0xac2   :  { %213 = vmax.xlane.f32.xlu1 %v212_v13 }
 0xb4b   :  { %v214_v15 = vpop.xlane.xlu1 %213 }
 0xb4c   :  { %vm215_vm7 = vcmp.eq.f32.partialorder %v212_v13, %v214_v15  ;;  %v220_v18 = vcvt.f32.s32 %v214_v15 }
 0xb4d   :  { %v216_v17 = vsel %vm215_vm7, %v211_v16, -inf }
 0xb4e   :  { %217 = vmax.xlane.f32.xlu0 %v216_v17  ;;  %v221_v20 = vshll.u32 %v220_v18, 16 }
 0xbd7   :  { %v218_v19 = vpop.xlane.xlu0 %217 }
 0xbd8   :  { %v219_v21 = vcvt.f32.s32 %v218_v19  ;;  %v604_v19 = vmin.f32 %v990_v0, %v992_v1 }
 0xbda   :  { %v222_v22 = vadd.s32 %v221_v20, %v219_v21 }
 0xbdc   :  { %vm223_vm8 = vcmp.eq.s32.totalorder %v996_v4, %v222_v22  ;;  %vm224_vm9 = vcmp.eq.s32.totalorder %v999_v5, %v222_v22 }
 0xbdd   :  { %v225_v23 = vsel %vm223_vm8, 1, %v196_v63  ;;  %v226_v24 = vsel %vm224_vm9, 1, %v197_v2  ;;  %v227_v25 = vsel %vm223_vm8, -inf, %v198_v3  ;;  %v228_v26 = vsel %vm224_vm9, -inf, %v199_v6 }
 0xbde   :  { %v229_v27 = vmax.f32 %v227_v25, %v228_v26 }
 0xbe0   :  { %230 = vmax.xlane.f32.xlu1 %v229_v27 }
 0xc69   :  { %v231_v28 = vpop.xlane.xlu1 %230 }
 0xc6a   :  { %vm232_vm10 = vcmp.eq.f32.partialorder %v227_v25, %v231_v28  ;;  %vm233_vm11 = vcmp.eq.f32.partialorder %v228_v26, %v231_v28 }
 0xc6b   :  { %v234_v29 = vsel %vm232_vm10, %v996_v4, 4294967295  ;;  %v235_v30 = vsel %vm233_vm11, %v999_v5, 4294967295 }
 0xc6c   :  { %vm236_vm12 = vcmp.gt.s32.totalorder %v234_v29, %v235_v30 }
 0xc6d   :  { %v237_v31 = vsel %vm236_vm12, %v234_v29, %v235_v30 }
 0xc6e   :  { %v239_v32 = vshra.s32 %v237_v31, 16  ;;  %v238_v34 = vand.u32 65535, %v237_v31 }
 0xc70   :  { %v241_v33 = vcvt.s32.f32 %v239_v32  ;;  %v240_v36 = vcvt.s32.f32 %v238_v34 }
 0xc72   :  { %242 = vmax.xlane.f32.xlu0 %v241_v33 }
 0xcfb   :  { %v243_v35 = vpop.xlane.xlu0 %242 }
 0xcfc   :  { %vm244_vm13 = vcmp.eq.f32.partialorder %v241_v33, %v243_v35  ;;  %v249_v38 = vcvt.f32.s32 %v243_v35 }
 0xcfd   :  { %v245_v37 = vsel %vm244_vm13, %v240_v36, -inf }
 0xcfe   :  { %246 = vmax.xlane.f32.xlu1 %v245_v37  ;;  %v250_v41 = vshll.u32 %v249_v38, 16 }
 0xd87   :  { %v247_v40 = vpop.xlane.xlu1 %246 }
 0xd88   :  { %v248_v42 = vcvt.f32.s32 %v247_v40 }
 0xd8a   :  { %v251_v43 = vadd.s32 %v250_v41, %v248_v42 }
 0xd8c   :  { %vm252_vm14 = vcmp.eq.s32.totalorder %v996_v4, %v251_v43  ;;  %vm253_vm15 = vcmp.eq.s32.totalorder %v999_v5, %v251_v43 }
 0xd8d   :  { %v254_v44 = vsel %vm252_vm14, 1, %v225_v23  ;;  %v255_v45 = vsel %vm253_vm15, 1, %v226_v24  ;;  %v256_v46 = vsel %vm252_vm14, -inf, %v227_v25  ;;  %v257_v47 = vsel %vm253_vm15, -inf, %v228_v26 }
 0xd8e   :  { %v258_v48 = vmax.f32 %v256_v46, %v257_v47 }
 0xd90   :  { %259 = vmax.xlane.f32.xlu0 %v258_v48 }
 0xe19   :  { %v260_v49 = vpop.xlane.xlu0 %259 }
 0xe1a   :  { %vm261_vm0 = vcmp.eq.f32.partialorder %v256_v46, %v260_v49  ;;  %vm262_vm1 = vcmp.eq.f32.partialorder %v257_v47, %v260_v49 }
 0xe1b   :  { %v263_v50 = vsel %vm261_vm0, %v996_v4, 4294967295  ;;  %v264_v51 = vsel %vm262_vm1, %v999_v5, 4294967295 }
 0xe1c   :  { %vm265_vm2 = vcmp.gt.s32.totalorder %v263_v50, %v264_v51 }
 0xe1d   :  { %v266_v52 = vsel %vm265_vm2, %v263_v50, %v264_v51 }
 0xe1e   :  { %v268_v53 = vshra.s32 %v266_v52, 16  ;;  %v267_v55 = vand.u32 65535, %v266_v52 }
 0xe20   :  { %v270_v54 = vcvt.s32.f32 %v268_v53  ;;  %v269_v57 = vcvt.s32.f32 %v267_v55 }
 0xe22   :  { %271 = vmax.xlane.f32.xlu1 %v270_v54 }
 0xeab   :  { %v272_v56 = vpop.xlane.xlu1 %271 }
 0xeac   :  { %vm273_vm3 = vcmp.eq.f32.partialorder %v270_v54, %v272_v56  ;;  %v278_v59 = vcvt.f32.s32 %v272_v56 }
 0xead   :  { %v274_v58 = vsel %vm273_vm3, %v269_v57, -inf }
 0xeae   :  { %275 = vmax.xlane.f32.xlu0 %v274_v58  ;;  %v279_v61 = vshll.u32 %v278_v59, 16 }
 0xf37   :  { %v276_v60 = vpop.xlane.xlu0 %275 }
 0xf38   :  { %v277_v62 = vcvt.f32.s32 %v276_v60 }
 0xf3a   :  { %v280_v63 = vadd.s32 %v279_v61, %v277_v62 }
 0xf3c   :  { %vm281_vm4 = vcmp.eq.s32.totalorder %v996_v4, %v280_v63  ;;  %vm282_vm5 = vcmp.eq.s32.totalorder %v999_v5, %v280_v63 }
 0xf3d   :  { %v283_v2 = vsel %vm281_vm4, 1, %v254_v44  ;;  %v284_v3 = vsel %vm282_vm5, 1, %v255_v45  ;;  %v285_v6 = vsel %vm281_vm4, -inf, %v256_v46  ;;  %v286_v7 = vsel %vm282_vm5, -inf, %v257_v47 }
 0xf3e   :  { %v287_v8 = vmax.f32 %v285_v6, %v286_v7 }
 0xf40   :  { %288 = vmax.xlane.f32.xlu1 %v287_v8 }
 0xfc9   :  { %v289_v9 = vpop.xlane.xlu1 %288 }
 0xfca   :  { %vm290_vm6 = vcmp.eq.f32.partialorder %v285_v6, %v289_v9  ;;  %vm291_vm7 = vcmp.eq.f32.partialorder %v286_v7, %v289_v9 }
 0xfcb   :  { %v292_v10 = vsel %vm290_vm6, %v996_v4, 4294967295  ;;  %v293_v11 = vsel %vm291_vm7, %v999_v5, 4294967295 }
 0xfcc   :  { %vm294_vm8 = vcmp.gt.s32.totalorder %v292_v10, %v293_v11 }
 0xfcd   :  { %v295_v12 = vsel %vm294_vm8, %v292_v10, %v293_v11 }
 0xfce   :  { %v297_v13 = vshra.s32 %v295_v12, 16  ;;  %v296_v15 = vand.u32 65535, %v295_v12 }
 0xfd0   :  { %v299_v14 = vcvt.s32.f32 %v297_v13  ;;  %v298_v17 = vcvt.s32.f32 %v296_v15 }
 0xfd2   :  { %300 = vmax.xlane.f32.xlu0 %v299_v14 }
0x105b   :  { %v301_v16 = vpop.xlane.xlu0 %300 }
0x105c   :  { %vm302_vm9 = vcmp.eq.f32.partialorder %v299_v14, %v301_v16  ;;  %v307_v20 = vcvt.f32.s32 %v301_v16 }
0x105d   :  { %v303_v18 = vsel %vm302_vm9, %v298_v17, -inf }
0x105e   :  { %304 = vmax.xlane.f32.xlu1 %v303_v18  ;;  %v308_v22 = vshll.u32 %v307_v20, 16 }
0x1062   :  { %605 = vmin.xlane.f32.xlu1 %v604_v19 }
0x10e7   :  { %v305_v21 = vpop.xlane.xlu1 %304 }
0x10e8   :  { %v306_v23 = vcvt.f32.s32 %v305_v21 }
0x10ea   :  { %v309_v24 = vadd.s32 %v308_v22, %v306_v23 }
0x10eb   :  { %v606_v25 = vpop.xlane.xlu1 %605 }
0x10ec   :  { %vm310_vm10 = vcmp.eq.s32.totalorder %v996_v4, %v309_v24  ;;  %vm311_vm11 = vcmp.eq.s32.totalorder %v999_v5, %v309_v24  ;;  %vm607_vm12 = vcmp.eq.f32.partialorder %v990_v0, %v606_v25  ;;  %vm608_vm13 = vcmp.eq.f32.partialorder %v992_v1, %v606_v25 }
0x10ed   :  { %v312_v26 = vsel %vm310_vm10, 1, %v283_v2  ;;  %v313_v27 = vsel %vm311_vm11, 1, %v284_v3  ;;  %v609_v28 = vsel %vm607_vm12, %v996_v4, 256  ;;  %v610_v29 = vsel %vm608_vm13, %v999_v5, 256 }
0x10ee   :  { %vm611_vm14 = vcmp.lt.s32.totalorder %v609_v28, %v610_v29  ;;  %v314_v30 = vsel %vm310_vm10, -inf, %v285_v6  ;;  %v315_v31 = vsel %vm311_vm11, -inf, %v286_v7 }
0x10ef   :  { %v316_v32 = vmax.f32 %v314_v30, %v315_v31  ;;  %v612_v33 = vsel %vm611_vm14, %v609_v28, %v610_v29 }
0x10f0   :  { %v614_v34 = vshra.s32 %v612_v33, 16  ;;  %v613_v36 = vand.u32 65535, %v612_v33 }
0x10f1   :  { %317 = vmax.xlane.f32.xlu0 %v316_v32 }
0x10f2   :  { %v616_v35 = vcvt.s32.f32 %v614_v34  ;;  %v615_v38 = vcvt.s32.f32 %v613_v36 }
0x10f4   :  { %617 = vmin.xlane.f32.xlu1 %v616_v35 }
0x117a   :  { %v318_v37 = vpop.xlane.xlu0 %317 }
0x117b   :  { %vm319_vm15 = vcmp.eq.f32.partialorder %v314_v30, %v318_v37  ;;  %vm320_vm0 = vcmp.eq.f32.partialorder %v315_v31, %v318_v37 }
0x117c   :  { %v321_v40 = vsel %vm319_vm15, %v996_v4, 4294967295  ;;  %v322_v41 = vsel %vm320_vm0, %v999_v5, 4294967295 }
0x117d   :  { %vm323_vm1 = vcmp.gt.s32.totalorder %v321_v40, %v322_v41  ;;  %v618_v42 = vpop.xlane.xlu1 %617 }
0x117e   :  { %vm619_vm2 = vcmp.eq.f32.partialorder %v616_v35, %v618_v42  ;;  %v324_v43 = vsel %vm323_vm1, %v321_v40, %v322_v41  ;;  %v624_v47 = vcvt.f32.s32 %v618_v42 }
0x117f   :  { %v620_v44 = vsel %vm619_vm2, %v615_v38, inf  ;;  %v326_v45 = vshra.s32 %v324_v43, 16  ;;  %v325_v49 = vand.u32 65535, %v324_v43 }
0x1180   :  { %621 = vmin.xlane.f32.xlu1 %v620_v44  ;;  %v625_v48 = vshll.u32 %v624_v47, 16 }
0x1181   :  { %v328_v46 = vcvt.s32.f32 %v326_v45  ;;  %v327_v54 = vcvt.s32.f32 %v325_v49 }
0x1183   :  { %329 = vmax.xlane.f32.xlu0 %v328_v46 }
0x1209   :  { %v622_v50 = vpop.xlane.xlu1 %621 }
0x120a   :  { %v623_v51 = vcvt.f32.s32 %v622_v50 }
0x120c   :  { %v626_v52 = vadd.s32 %v625_v48, %v623_v51  ;;  %v330_v53 = vpop.xlane.xlu0 %329 }
0x120d   :  { %vm331_vm3 = vcmp.eq.f32.partialorder %v328_v46, %v330_v53  ;;  %v336_v59 = vcvt.f32.s32 %v330_v53 }
0x120e   :  { %vm627_vm4 = vcmp.eq.s32.totalorder %v996_v4, %v626_v52  ;;  %vm628_vm5 = vcmp.eq.s32.totalorder %v999_v5, %v626_v52  ;;  %v332_v55 = vsel %vm331_vm3, %v327_v54, -inf }
0x120f   :  { %333 = vmax.xlane.f32.xlu0 %v332_v55  ;;  %v631_v56 = vsel %vm627_vm4, inf, %v990_v0  ;;  %v632_v57 = vsel %vm628_vm5, inf, %v992_v1  ;;  %v337_v61 = vshll.u32 %v336_v59, 16  ;;  %v630_v32 = vsel %vm628_vm5, 1, %v974_v39 }
0x1210   :  { %v633_v58 = vmin.f32 %v631_v56, %v632_v57 }
0x1212   :  { %634 = vmin.xlane.f32.xlu1 %v633_v58 }
0x1298   :  { %v334_v60 = vpop.xlane.xlu0 %333 }
0x1299   :  { %v335_v62 = vcvt.f32.s32 %v334_v60 }
0x129b   :  { %v338_v63 = vadd.s32 %v337_v61, %v335_v62  ;;  %v635_v2 = vpop.xlane.xlu1 %634 }
0x129c   :  { %vm636_vm8 = vcmp.eq.f32.partialorder %v631_v56, %v635_v2  ;;  %vm637_vm9 = vcmp.eq.f32.partialorder %v632_v57, %v635_v2 }
0x129d   :  { %vm339_vm6 = vcmp.eq.s32.totalorder %v996_v4, %v338_v63  ;;  %vm340_vm7 = vcmp.eq.s32.totalorder %v999_v5, %v338_v63  ;;  %v638_v6 = vsel %vm636_vm8, %v996_v4, 256  ;;  %v639_v1 = vsel %vm637_vm9, %v999_v5, 256 }
0x129e   :  { %v341_v3 = vsel %vm339_vm6, 1, %v312_v26  ;;  %v342_v0 = vsel %vm340_vm7, 1, %v313_v27  ;;  %vm640_vm10 = vcmp.lt.s32.totalorder %v638_v6, %v639_v1  ;;  %v343_v7 = vsel %vm339_vm6, -inf, %v314_v30 }
0x129f   :  { %v344_v8 = vsel %vm340_vm7, -inf, %v315_v31  ;;  %v641_v10 = vsel %vm640_vm10, %v638_v6, %v639_v1  ;;  %v629_v31 = vsel %vm627_vm4, 1, %v974_v39 }
0x12a0   :  { %v345_v9 = vmax.f32 %v343_v7, %v344_v8  ;;  %v643_v11 = vshra.s32 %v641_v10, 16  ;;  %v642_v13 = vand.u32 65535, %v641_v10 }
0x12a2   :  { %346 = vmax.xlane.f32.xlu0 %v345_v9  ;;  %v645_v12 = vcvt.s32.f32 %v643_v11  ;;  %v644_v18 = vcvt.s32.f32 %v642_v13 }
0x12a4   :  { %646 = vmin.xlane.f32.xlu1 %v645_v12 }
0x132b   :  { %v347_v14 = vpop.xlane.xlu0 %346 }
0x132c   :  { %vm348_vm11 = vcmp.eq.f32.partialorder %v343_v7, %v347_v14  ;;  %vm349_vm12 = vcmp.eq.f32.partialorder %v344_v8, %v347_v14 }
0x132d   :  { %v350_v15 = vsel %vm348_vm11, %v996_v4, 4294967295  ;;  %v351_v16 = vsel %vm349_vm12, %v999_v5, 4294967295  ;;  %v647_v17 = vpop.xlane.xlu1 %646 }
0x132e   :  { %vm352_vm13 = vcmp.gt.s32.totalorder %v350_v15, %v351_v16  ;;  %vm648_vm14 = vcmp.eq.f32.partialorder %v645_v12, %v647_v17  ;;  %v653_v23 = vcvt.f32.s32 %v647_v17 }
0x132f   :  { %v353_v19 = vsel %vm352_vm13, %v350_v15, %v351_v16  ;;  %v649_v20 = vsel %vm648_vm14, %v644_v18, inf }
0x1330   :  { %v355_v21 = vshra.s32 %v353_v19, 16  ;;  %650 = vmin.xlane.f32.xlu1 %v649_v20  ;;  %v354_v24 = vand.u32 65535, %v353_v19  ;;  %v654_v26 = vshll.u32 %v653_v23, 16 }
0x1332   :  { %v357_v22 = vcvt.s32.f32 %v355_v21  ;;  %v356_v30 = vcvt.s32.f32 %v354_v24 }
0x1334   :  { %358 = vmax.xlane.f32.xlu0 %v357_v22 }
0x13b9   :  { %v651_v25 = vpop.xlane.xlu1 %650 }
0x13ba   :  { %v652_v27 = vcvt.f32.s32 %v651_v25 }
0x13bc   :  { %v655_v28 = vadd.s32 %v654_v26, %v652_v27 }
0x13bd   :  { %v359_v29 = vpop.xlane.xlu0 %358 }
0x13be   :  { %vm360_vm15 = vcmp.eq.f32.partialorder %v357_v22, %v359_v29  ;;  %vm656_vm0 = vcmp.eq.s32.totalorder %v996_v4, %v655_v28  ;;  %vm657_vm1 = vcmp.eq.s32.totalorder %v999_v5, %v655_v28  ;;  %v365_v40 = vcvt.f32.s32 %v359_v29 }
0x13bf   :  { %v361_v33 = vsel %vm360_vm15, %v356_v30, -inf  ;;  %v658_v34 = vsel %vm656_vm0, 1, %v629_v31  ;;  %v659_v35 = vsel %vm657_vm1, 1, %v630_v32  ;;  %v660_v36 = vsel %vm656_vm0, inf, %v631_v56 }
0x13c0   :  { %362 = vmax.xlane.f32.xlu0 %v361_v33  ;;  %v661_v37 = vsel %vm657_vm1, inf, %v632_v57  ;;  %v366_v42 = vshll.u32 %v365_v40, 16 }
0x13c1   :  { %v662_v38 = vmin.f32 %v660_v36, %v661_v37 }
0x13c3   :  { %663 = vmin.xlane.f32.xlu1 %v662_v38 }
0x1449   :  { %v363_v41 = vpop.xlane.xlu0 %362 }
0x144a   :  { %v364_v43 = vcvt.f32.s32 %v363_v41 }
0x144c   :  { %v367_v44 = vadd.s32 %v366_v42, %v364_v43  ;;  %v664_v45 = vpop.xlane.xlu1 %663 }
0x144d   :  { %vm665_vm4 = vcmp.eq.f32.partialorder %v660_v36, %v664_v45  ;;  %vm666_vm5 = vcmp.eq.f32.partialorder %v661_v37, %v664_v45 }
0x144e   :  { %vm368_vm2 = vcmp.eq.s32.totalorder %v996_v4, %v367_v44  ;;  %vm369_vm3 = vcmp.eq.s32.totalorder %v999_v5, %v367_v44  ;;  %v667_v47 = vsel %vm665_vm4, %v996_v4, 256  ;;  %v668_v48 = vsel %vm666_vm5, %v999_v5, 256 }
0x144f   :  { %v370_v39 = vsel %vm368_vm2, 1, %v341_v3  ;;  %v371_v46 = vsel %vm369_vm3, 1, %v342_v0  ;;  %vm669_vm6 = vcmp.lt.s32.totalorder %v667_v47, %v668_v48  ;;  %v372_v49 = vsel %vm368_vm2, -inf, %v343_v7 }
0x1450   :  { %v373_v50 = vsel %vm369_vm3, -inf, %v344_v8  ;;  %v670_v52 = vsel %vm669_vm6, %v667_v47, %v668_v48 }
0x1451   :  { %v374_v51 = vmax.f32 %v372_v49, %v373_v50  ;;  %v672_v53 = vshra.s32 %v670_v52, 16  ;;  %v671_v55 = vand.u32 65535, %v670_v52 }
0x1453   :  { %375 = vmax.xlane.f32.xlu0 %v374_v51  ;;  %v674_v54 = vcvt.s32.f32 %v672_v53  ;;  %v673_v60 = vcvt.s32.f32 %v671_v55 }
0x1455   :  { %675 = vmin.xlane.f32.xlu1 %v674_v54 }
0x14dc   :  { %v376_v56 = vpop.xlane.xlu0 %375 }
0x14dd   :  { %vm377_vm7 = vcmp.eq.f32.partialorder %v372_v49, %v376_v56  ;;  %vm378_vm8 = vcmp.eq.f32.partialorder %v373_v50, %v376_v56 }
0x14de   :  { %v379_v57 = vsel %vm377_vm7, %v996_v4, 4294967295  ;;  %v380_v58 = vsel %vm378_vm8, %v999_v5, 4294967295  ;;  %v676_v59 = vpop.xlane.xlu1 %675 }
0x14df   :  { %vm381_vm9 = vcmp.gt.s32.totalorder %v379_v57, %v380_v58  ;;  %vm677_vm10 = vcmp.eq.f32.partialorder %v674_v54, %v676_v59  ;;  %v682_v3 = vcvt.f32.s32 %v676_v59 }
0x14e0   :  { %v382_v61 = vsel %vm381_vm9, %v379_v57, %v380_v58  ;;  %v678_v62 = vsel %vm677_vm10, %v673_v60, inf }
0x14e1   :  { %v384_v63 = vshra.s32 %v382_v61, 16  ;;  %679 = vmin.xlane.f32.xlu1 %v678_v62  ;;  %v383_v0 = vand.u32 65535, %v382_v61  ;;  %v683_v1 = vshll.u32 %v682_v3, 16 }
0x14e3   :  { %v386_v2 = vcvt.s32.f32 %v384_v63  ;;  %v385_v10 = vcvt.s32.f32 %v383_v0 }
0x14e5   :  { %387 = vmax.xlane.f32.xlu0 %v386_v2 }
0x156a   :  { %v680_v6 = vpop.xlane.xlu1 %679 }
0x156b   :  { %v681_v7 = vcvt.f32.s32 %v680_v6 }
0x156d   :  { %v684_v8 = vadd.s32 %v683_v1, %v681_v7 }
0x156e   :  { %v388_v9 = vpop.xlane.xlu0 %387 }
0x156f   :  { %vm389_vm11 = vcmp.eq.f32.partialorder %v386_v2, %v388_v9  ;;  %vm685_vm12 = vcmp.eq.s32.totalorder %v996_v4, %v684_v8  ;;  %vm686_vm13 = vcmp.eq.s32.totalorder %v999_v5, %v684_v8  ;;  %v394_v17 = vcvt.f32.s32 %v388_v9 }
0x1570   :  { %v390_v11 = vsel %vm389_vm11, %v385_v10, -inf  ;;  %v687_v12 = vsel %vm685_vm12, 1, %v658_v34  ;;  %v688_v13 = vsel %vm686_vm13, 1, %v659_v35  ;;  %v689_v14 = vsel %vm685_vm12, inf, %v660_v36 }
0x1571   :  { %391 = vmax.xlane.f32.xlu0 %v390_v11  ;;  %v690_v15 = vsel %vm686_vm13, inf, %v661_v37  ;;  %v395_v19 = vshll.u32 %v394_v17, 16 }
0x1572   :  { %v691_v16 = vmin.f32 %v689_v14, %v690_v15 }
0x1574   :  { %692 = vmin.xlane.f32.xlu1 %v691_v16 }
0x15fa   :  { %v392_v18 = vpop.xlane.xlu0 %391 }
0x15fb   :  { %v393_v20 = vcvt.f32.s32 %v392_v18 }
0x15fd   :  { %v396_v21 = vadd.s32 %v395_v19, %v393_v20  ;;  %v693_v22 = vpop.xlane.xlu1 %692 }
0x15fe   :  { %vm694_vm0 = vcmp.eq.f32.partialorder %v689_v14, %v693_v22  ;;  %vm695_vm1 = vcmp.eq.f32.partialorder %v690_v15, %v693_v22 }
0x15ff   :  { %vm397_vm14 = vcmp.eq.s32.totalorder %v996_v4, %v396_v21  ;;  %vm398_vm15 = vcmp.eq.s32.totalorder %v999_v5, %v396_v21  ;;  %v696_v25 = vsel %vm694_vm0, %v996_v4, 256  ;;  %v697_v26 = vsel %vm695_vm1, %v999_v5, 256 }
0x1600   :  { %v399_v23 = vsel %vm397_vm14, 1, %v370_v39  ;;  %v400_v24 = vsel %vm398_vm15, 1, %v371_v46  ;;  %vm698_vm2 = vcmp.lt.s32.totalorder %v696_v25, %v697_v26  ;;  %v401_v27 = vsel %vm397_vm14, -inf, %v372_v49 }
0x1601   :  { %v402_v28 = vsel %vm398_vm15, -inf, %v373_v50  ;;  %v699_v30 = vsel %vm698_vm2, %v696_v25, %v697_v26 }
0x1602   :  { %v403_v29 = vmax.f32 %v401_v27, %v402_v28  ;;  %v701_v31 = vshra.s32 %v699_v30, 16  ;;  %v700_v33 = vand.u32 65535, %v699_v30 }
0x1604   :  { %404 = vmax.xlane.f32.xlu0 %v403_v29  ;;  %v703_v32 = vcvt.s32.f32 %v701_v31  ;;  %v702_v38 = vcvt.s32.f32 %v700_v33 }
0x1606   :  { %704 = vmin.xlane.f32.xlu1 %v703_v32 }
0x168d   :  { %v405_v34 = vpop.xlane.xlu0 %404 }
0x168e   :  { %vm406_vm3 = vcmp.eq.f32.partialorder %v401_v27, %v405_v34  ;;  %vm407_vm4 = vcmp.eq.f32.partialorder %v402_v28, %v405_v34 }
0x168f   :  { %v408_v35 = vsel %vm406_vm3, %v996_v4, 4294967295  ;;  %v409_v36 = vsel %vm407_vm4, %v999_v5, 4294967295  ;;  %v705_v37 = vpop.xlane.xlu1 %704 }
0x1690   :  { %vm410_vm5 = vcmp.gt.s32.totalorder %v408_v35, %v409_v36  ;;  %vm706_vm6 = vcmp.eq.f32.partialorder %v703_v32, %v705_v37  ;;  %v711_v44 = vcvt.f32.s32 %v705_v37 }
0x1691   :  { %v411_v40 = vsel %vm410_vm5, %v408_v35, %v409_v36  ;;  %v707_v41 = vsel %vm706_vm6, %v702_v38, inf }
0x1692   :  { %v413_v42 = vshra.s32 %v411_v40, 16  ;;  %708 = vmin.xlane.f32.xlu1 %v707_v41  ;;  %v412_v45 = vand.u32 65535, %v411_v40  ;;  %v712_v46 = vshll.u32 %v711_v44, 16 }
0x1694   :  { %v415_v43 = vcvt.s32.f32 %v413_v42  ;;  %v414_v50 = vcvt.s32.f32 %v412_v45 }
0x1696   :  { %416 = vmax.xlane.f32.xlu0 %v415_v43 }
0x171b   :  { %v709_v39 = vpop.xlane.xlu1 %708 }
0x171c   :  { %v710_v47 = vcvt.f32.s32 %v709_v39 }
0x171e   :  { %v713_v48 = vadd.s32 %v712_v46, %v710_v47 }
0x171f   :  { %v417_v49 = vpop.xlane.xlu0 %416 }
0x1720   :  { %vm418_vm7 = vcmp.eq.f32.partialorder %v415_v43, %v417_v49  ;;  %vm714_vm8 = vcmp.eq.s32.totalorder %v996_v4, %v713_v48  ;;  %vm715_vm9 = vcmp.eq.s32.totalorder %v999_v5, %v713_v48  ;;  %v423_v57 = vcvt.f32.s32 %v417_v49 }
0x1721   :  { %v419_v51 = vsel %vm418_vm7, %v414_v50, -inf  ;;  %v716_v52 = vsel %vm714_vm8, 1, %v687_v12  ;;  %v717_v53 = vsel %vm715_vm9, 1, %v688_v13  ;;  %v718_v54 = vsel %vm714_vm8, inf, %v689_v14 }
0x1722   :  { %420 = vmax.xlane.f32.xlu0 %v419_v51  ;;  %v719_v55 = vsel %vm715_vm9, inf, %v690_v15  ;;  %v424_v59 = vshll.u32 %v423_v57, 16 }
0x1723   :  { %v720_v56 = vmin.f32 %v718_v54, %v719_v55 }
0x1725   :  { %721 = vmin.xlane.f32.xlu1 %v720_v56 }
0x17ab   :  { %v421_v58 = vpop.xlane.xlu0 %420 }
0x17ac   :  { %v422_v60 = vcvt.f32.s32 %v421_v58 }
0x17ae   :  { %v425_v61 = vadd.s32 %v424_v59, %v422_v60  ;;  %v722_v62 = vpop.xlane.xlu1 %721 }
0x17af   :  { %vm723_vm12 = vcmp.eq.f32.partialorder %v718_v54, %v722_v62  ;;  %vm724_vm13 = vcmp.eq.f32.partialorder %v719_v55, %v722_v62 }
0x17b0   :  { %vm426_vm10 = vcmp.eq.s32.totalorder %v996_v4, %v425_v61  ;;  %vm427_vm11 = vcmp.eq.s32.totalorder %v999_v5, %v425_v61  ;;  %v725_v3 = vsel %vm723_vm12, %v996_v4, 256  ;;  %v726_v0 = vsel %vm724_vm13, %v999_v5, 256 }
0x17b1   :  { %v428_v63 = vsel %vm426_vm10, 1, %v399_v23  ;;  %v429_v2 = vsel %vm427_vm11, 1, %v400_v24  ;;  %vm727_vm14 = vcmp.lt.s32.totalorder %v725_v3, %v726_v0  ;;  %v430_v6 = vsel %vm426_vm10, -inf, %v401_v27 }
0x17b2   :  { %v431_v1 = vsel %vm427_vm11, -inf, %v402_v28  ;;  %v728_v8 = vsel %vm727_vm14, %v725_v3, %v726_v0 }
0x17b3   :  { %v432_v7 = vmax.f32 %v430_v6, %v431_v1  ;;  %v730_v9 = vshra.s32 %v728_v8, 16  ;;  %v729_v11 = vand.u32 65535, %v728_v8 }
0x17b5   :  { %433 = vmax.xlane.f32.xlu0 %v432_v7  ;;  %v732_v10 = vcvt.s32.f32 %v730_v9  ;;  %v731_v16 = vcvt.s32.f32 %v729_v11 }
0x17b7   :  { %733 = vmin.xlane.f32.xlu1 %v732_v10 }
0x183e   :  { %v434_v12 = vpop.xlane.xlu0 %433 }
0x183f   :  { %vm435_vm15 = vcmp.eq.f32.partialorder %v430_v6, %v434_v12  ;;  %vm436_vm0 = vcmp.eq.f32.partialorder %v431_v1, %v434_v12 }
0x1840   :  { %v437_v13 = vsel %vm435_vm15, %v996_v4, 4294967295  ;;  %v438_v14 = vsel %vm436_vm0, %v999_v5, 4294967295  ;;  %v734_v15 = vpop.xlane.xlu1 %733 }
0x1841   :  { %vm439_vm1 = vcmp.gt.s32.totalorder %v437_v13, %v438_v14  ;;  %vm735_vm2 = vcmp.eq.f32.partialorder %v732_v10, %v734_v15  ;;  %v740_v21 = vcvt.f32.s32 %v734_v15 }
0x1842   :  { %v440_v17 = vsel %vm439_vm1, %v437_v13, %v438_v14  ;;  %v736_v18 = vsel %vm735_vm2, %v731_v16, inf }
0x1843   :  { %v442_v19 = vshra.s32 %v440_v17, 16  ;;  %737 = vmin.xlane.f32.xlu1 %v736_v18  ;;  %v441_v22 = vand.u32 65535, %v440_v17  ;;  %v741_v24 = vshll.u32 %v740_v21, 16 }
0x1845   :  { %v444_v20 = vcvt.s32.f32 %v442_v19  ;;  %v443_v28 = vcvt.s32.f32 %v441_v22 }
0x1847   :  { %445 = vmax.xlane.f32.xlu0 %v444_v20 }
0x18cc   :  { %v738_v23 = vpop.xlane.xlu1 %737 }
0x18cd   :  { %v739_v25 = vcvt.f32.s32 %v738_v23 }
0x18cf   :  { %v742_v26 = vadd.s32 %v741_v24, %v739_v25 }
0x18d0   :  { %v446_v27 = vpop.xlane.xlu0 %445 }
0x18d1   :  { %vm447_vm3 = vcmp.eq.f32.partialorder %v444_v20, %v446_v27  ;;  %vm743_vm4 = vcmp.eq.s32.totalorder %v996_v4, %v742_v26  ;;  %vm744_vm5 = vcmp.eq.s32.totalorder %v999_v5, %v742_v26  ;;  %v452_v35 = vcvt.f32.s32 %v446_v27 }
0x18d2   :  { %v448_v29 = vsel %vm447_vm3, %v443_v28, -inf  ;;  %v745_v30 = vsel %vm743_vm4, 1, %v716_v52  ;;  %v746_v31 = vsel %vm744_vm5, 1, %v717_v53  ;;  %v747_v32 = vsel %vm743_vm4, inf, %v718_v54 }
0x18d3   :  { %449 = vmax.xlane.f32.xlu0 %v448_v29  ;;  %v748_v33 = vsel %vm744_vm5, inf, %v719_v55  ;;  %v453_v37 = vshll.u32 %v452_v35, 16 }
0x18d4   :  { %v749_v34 = vmin.f32 %v747_v32, %v748_v33 }
0x18d6   :  { %750 = vmin.xlane.f32.xlu1 %v749_v34 }
0x195c   :  { %v450_v36 = vpop.xlane.xlu0 %449 }
0x195d   :  { %v451_v38 = vcvt.f32.s32 %v450_v36 }
0x195f   :  { %v454_v40 = vadd.s32 %v453_v37, %v451_v38  ;;  %v751_v41 = vpop.xlane.xlu1 %750 }
0x1960   :  { %vm752_vm8 = vcmp.eq.f32.partialorder %v747_v32, %v751_v41  ;;  %vm753_vm9 = vcmp.eq.f32.partialorder %v748_v33, %v751_v41 }
0x1961   :  { %vm455_vm6 = vcmp.eq.s32.totalorder %v996_v4, %v454_v40  ;;  %vm456_vm7 = vcmp.eq.s32.totalorder %v999_v5, %v454_v40  ;;  %v754_v44 = vsel %vm752_vm8, %v996_v4, 256  ;;  %v755_v45 = vsel %vm753_vm9, %v999_v5, 256 }
0x1962   :  { %v457_v42 = vsel %vm455_vm6, 1, %v428_v63  ;;  %v458_v43 = vsel %vm456_vm7, 1, %v429_v2  ;;  %vm756_vm10 = vcmp.lt.s32.totalorder %v754_v44, %v755_v45  ;;  %v459_v39 = vsel %vm455_vm6, -inf, %v430_v6 }
0x1963   :  { %v460_v46 = vsel %vm456_vm7, -inf, %v431_v1  ;;  %v757_v48 = vsel %vm756_vm10, %v754_v44, %v755_v45 }
0x1964   :  { %v461_v47 = vmax.f32 %v459_v39, %v460_v46  ;;  %v759_v49 = vshra.s32 %v757_v48, 16  ;;  %v758_v51 = vand.u32 65535, %v757_v48 }
0x1966   :  { %462 = vmax.xlane.f32.xlu0 %v461_v47  ;;  %v761_v50 = vcvt.s32.f32 %v759_v49  ;;  %v760_v56 = vcvt.s32.f32 %v758_v51 }
0x1968   :  { %762 = vmin.xlane.f32.xlu1 %v761_v50 }
0x19ef   :  { %v463_v52 = vpop.xlane.xlu0 %462 }
0x19f0   :  { %vm464_vm11 = vcmp.eq.f32.partialorder %v459_v39, %v463_v52  ;;  %vm465_vm12 = vcmp.eq.f32.partialorder %v460_v46, %v463_v52 }
0x19f1   :  { %v466_v53 = vsel %vm464_vm11, %v996_v4, 4294967295  ;;  %v467_v54 = vsel %vm465_vm12, %v999_v5, 4294967295  ;;  %v763_v55 = vpop.xlane.xlu1 %762 }
0x19f2   :  { %vm468_vm13 = vcmp.gt.s32.totalorder %v466_v53, %v467_v54  ;;  %vm764_vm14 = vcmp.eq.f32.partialorder %v761_v50, %v763_v55  ;;  %v769_v61 = vcvt.f32.s32 %v763_v55 }
0x19f3   :  { %v469_v57 = vsel %vm468_vm13, %v466_v53, %v467_v54  ;;  %v765_v58 = vsel %vm764_vm14, %v760_v56, inf }
0x19f4   :  { %v471_v59 = vshra.s32 %v469_v57, 16  ;;  %766 = vmin.xlane.f32.xlu1 %v765_v58  ;;  %v470_v62 = vand.u32 65535, %v469_v57  ;;  %v770_v2 = vshll.u32 %v769_v61, 16 }
0x19f6   :  { %v473_v60 = vcvt.s32.f32 %v471_v59  ;;  %v472_v1 = vcvt.s32.f32 %v470_v62 }
0x19f8   :  { %474 = vmax.xlane.f32.xlu0 %v473_v60 }
0x1a7d   :  { %v767_v63 = vpop.xlane.xlu1 %766 }
0x1a7e   :  { %v768_v3 = vcvt.f32.s32 %v767_v63 }
0x1a80   :  { %v771_v0 = vadd.s32 %v770_v2, %v768_v3 }
0x1a81   :  { %v475_v6 = vpop.xlane.xlu0 %474 }
0x1a82   :  { %vm476_vm15 = vcmp.eq.f32.partialorder %v473_v60, %v475_v6  ;;  %vm772_vm0 = vcmp.eq.s32.totalorder %v996_v4, %v771_v0  ;;  %vm773_vm1 = vcmp.eq.s32.totalorder %v999_v5, %v771_v0  ;;  %v481_v13 = vcvt.f32.s32 %v475_v6 }
0x1a83   :  { %v477_v7 = vsel %vm476_vm15, %v472_v1, -inf  ;;  %v774_v8 = vsel %vm772_vm0, 1, %v745_v30  ;;  %v775_v9 = vsel %vm773_vm1, 1, %v746_v31  ;;  %v776_v10 = vsel %vm772_vm0, inf, %v747_v32 }
0x1a84   :  { %478 = vmax.xlane.f32.xlu0 %v477_v7  ;;  %v777_v11 = vsel %vm773_vm1, inf, %v748_v33  ;;  %v482_v15 = vshll.u32 %v481_v13, 16 }
0x1a85   :  { %v778_v12 = vmin.f32 %v776_v10, %v777_v11 }
0x1a87   :  { %779 = vmin.xlane.f32.xlu1 %v778_v12 }
0x1b0d   :  { %v479_v14 = vpop.xlane.xlu0 %478 }
0x1b0e   :  { %v480_v16 = vcvt.f32.s32 %v479_v14 }
0x1b10   :  { %v483_v17 = vadd.s32 %v482_v15, %v480_v16  ;;  %v780_v18 = vpop.xlane.xlu1 %779 }
0x1b11   :  { %vm781_vm4 = vcmp.eq.f32.partialorder %v776_v10, %v780_v18  ;;  %vm782_vm5 = vcmp.eq.f32.partialorder %v777_v11, %v780_v18 }
0x1b12   :  { %vm484_vm2 = vcmp.eq.s32.totalorder %v996_v4, %v483_v17  ;;  %vm485_vm3 = vcmp.eq.s32.totalorder %v999_v5, %v483_v17  ;;  %v783_v21 = vsel %vm781_vm4, %v996_v4, 256  ;;  %v784_v22 = vsel %vm782_vm5, %v999_v5, 256 }
0x1b13   :  { %v486_v19 = vsel %vm484_vm2, 1, %v457_v42  ;;  %v487_v20 = vsel %vm485_vm3, 1, %v458_v43  ;;  %vm785_vm6 = vcmp.lt.s32.totalorder %v783_v21, %v784_v22  ;;  %v488_v23 = vsel %vm484_vm2, -inf, %v459_v39 }
0x1b14   :  { %v489_v24 = vsel %vm485_vm3, -inf, %v460_v46  ;;  %v786_v26 = vsel %vm785_vm6, %v783_v21, %v784_v22 }
0x1b15   :  { %v490_v25 = vmax.f32 %v488_v23, %v489_v24  ;;  %v788_v27 = vshra.s32 %v786_v26, 16  ;;  %v787_v29 = vand.u32 65535, %v786_v26 }
0x1b17   :  { %491 = vmax.xlane.f32.xlu0 %v490_v25  ;;  %v790_v28 = vcvt.s32.f32 %v788_v27  ;;  %v789_v34 = vcvt.s32.f32 %v787_v29 }
0x1b19   :  { %791 = vmin.xlane.f32.xlu1 %v790_v28 }
0x1ba0   :  { %v492_v30 = vpop.xlane.xlu0 %491 }
0x1ba1   :  { %vm493_vm7 = vcmp.eq.f32.partialorder %v488_v23, %v492_v30  ;;  %vm494_vm8 = vcmp.eq.f32.partialorder %v489_v24, %v492_v30 }
0x1ba2   :  { %v495_v31 = vsel %vm493_vm7, %v996_v4, 4294967295  ;;  %v496_v32 = vsel %vm494_vm8, %v999_v5, 4294967295  ;;  %v792_v33 = vpop.xlane.xlu1 %791 }
0x1ba3   :  { %vm497_vm9 = vcmp.gt.s32.totalorder %v495_v31, %v496_v32  ;;  %vm793_vm10 = vcmp.eq.f32.partialorder %v790_v28, %v792_v33  ;;  %v798_v40 = vcvt.f32.s32 %v792_v33 }
0x1ba4   :  { %v498_v35 = vsel %vm497_vm9, %v495_v31, %v496_v32  ;;  %v794_v36 = vsel %vm793_vm10, %v789_v34, inf }
0x1ba5   :  { %v500_v37 = vshra.s32 %v498_v35, 16  ;;  %795 = vmin.xlane.f32.xlu1 %v794_v36  ;;  %v499_v41 = vand.u32 65535, %v498_v35  ;;  %v799_v43 = vshll.u32 %v798_v40, 16 }
0x1ba7   :  { %v502_v38 = vcvt.s32.f32 %v500_v37  ;;  %v501_v46 = vcvt.s32.f32 %v499_v41 }
0x1ba9   :  { %503 = vmax.xlane.f32.xlu0 %v502_v38 }
0x1c2e   :  { %v796_v42 = vpop.xlane.xlu1 %795 }
0x1c2f   :  { %v797_v44 = vcvt.f32.s32 %v796_v42 }
0x1c31   :  { %v800_v45 = vadd.s32 %v799_v43, %v797_v44 }
0x1c32   :  { %v504_v39 = vpop.xlane.xlu0 %503 }
0x1c33   :  { %vm505_vm11 = vcmp.eq.f32.partialorder %v502_v38, %v504_v39  ;;  %vm801_vm12 = vcmp.eq.s32.totalorder %v996_v4, %v800_v45  ;;  %vm802_vm13 = vcmp.eq.s32.totalorder %v999_v5, %v800_v45  ;;  %v510_v53 = vcvt.f32.s32 %v504_v39 }
0x1c34   :  { %v506_v47 = vsel %vm505_vm11, %v501_v46, -inf  ;;  %v1125_v48 = vsel %vm801_vm12, 1, %v774_v8  ;;  %v804_v49 = vsel %vm802_vm13, 1, %v775_v9  ;;  %v805_v50 = vsel %vm801_vm12, inf, %v776_v10 }
0x1c35   :  { %507 = vmax.xlane.f32.xlu0 %v506_v47  ;;  %v806_v51 = vsel %vm802_vm13, inf, %v777_v11  ;;  %v511_v55 = vshll.u32 %v510_v53, 16 }
0x1c36   :  { %v807_v52 = vmin.f32 %v805_v50, %v806_v51 }
0x1c38   :  { %808 = vmin.xlane.f32.xlu1 %v807_v52 }
0x1cbe   :  { %v508_v54 = vpop.xlane.xlu0 %507 }
0x1cbf   :  { %v509_v56 = vcvt.f32.s32 %v508_v54 }
0x1cc1   :  { %v512_v57 = vadd.s32 %v511_v55, %v509_v56  ;;  %v809_v58 = vpop.xlane.xlu1 %808 }
0x1cc2   :  { %vm810_vm0 = vcmp.eq.f32.partialorder %v805_v50, %v809_v58  ;;  %vm811_vm1 = vcmp.eq.f32.partialorder %v806_v51, %v809_v58 }
0x1cc3   :  { %vm513_vm14 = vcmp.eq.s32.totalorder %v996_v4, %v512_v57  ;;  %vm514_vm15 = vcmp.eq.s32.totalorder %v999_v5, %v512_v57  ;;  %v812_v61 = vsel %vm810_vm0, %v996_v4, 256  ;;  %v813_v62 = vsel %vm811_vm1, %v999_v5, 256 }
0x1cc4   :  { %v1129_v59 = vsel %vm513_vm14, 1, %v486_v19  ;;  %v516_v60 = vsel %vm514_vm15, 1, %v487_v20  ;;  %vm814_vm2 = vcmp.lt.s32.totalorder %v812_v61, %v813_v62  ;;  %v517_v63 = vsel %vm513_vm14, -inf, %v488_v23 }
0x1cc5   :  { %v518_v2 = vsel %vm514_vm15, -inf, %v489_v24  ;;  %v815_v0 = vsel %vm814_vm2, %v812_v61, %v813_v62 }
0x1cc6   :  { %v519_v3 = vmax.f32 %v517_v63, %v518_v2  ;;  %v817_v6 = vshra.s32 %v815_v0, 16  ;;  %v816_v7 = vand.u32 65535, %v815_v0 }
0x1cc8   :  { %520 = vmax.xlane.f32.xlu0 %v519_v3  ;;  %v819_v1 = vcvt.s32.f32 %v817_v6  ;;  %v818_v12 = vcvt.s32.f32 %v816_v7 }
0x1cca   :  { %820 = vmin.xlane.f32.xlu1 %v819_v1 }
0x1d51   :  { %v521_v8 = vpop.xlane.xlu0 %520 }
0x1d52   :  { %vm522_vm3 = vcmp.eq.f32.partialorder %v517_v63, %v521_v8  ;;  %vm523_vm4 = vcmp.eq.f32.partialorder %v518_v2, %v521_v8 }
0x1d53   :  { %v524_v9 = vsel %vm522_vm3, %v996_v4, 4294967295  ;;  %v525_v10 = vsel %vm523_vm4, %v999_v5, 4294967295  ;;  %v821_v11 = vpop.xlane.xlu1 %820 }
0x1d54   :  { %vm526_vm5 = vcmp.gt.s32.totalorder %v524_v9, %v525_v10  ;;  %vm822_vm6 = vcmp.eq.f32.partialorder %v819_v1, %v821_v11  ;;  %v827_v17 = vcvt.f32.s32 %v821_v11 }
0x1d55   :  { %v527_v13 = vsel %vm526_vm5, %v524_v9, %v525_v10  ;;  %v823_v14 = vsel %vm822_vm6, %v818_v12, inf }
0x1d56   :  { %v529_v15 = vshra.s32 %v527_v13, 16  ;;  %824 = vmin.xlane.f32.xlu1 %v823_v14  ;;  %v528_v18 = vand.u32 65535, %v527_v13  ;;  %v828_v20 = vshll.u32 %v827_v17, 16 }
0x1d58   :  { %v531_v16 = vcvt.s32.f32 %v529_v15  ;;  %v530_v24 = vcvt.s32.f32 %v528_v18 }
0x1d5a   :  { %532 = vmax.xlane.f32.xlu0 %v531_v16 }
0x1ddf   :  { %v825_v19 = vpop.xlane.xlu1 %824 }
0x1de0   :  { %v826_v21 = vcvt.f32.s32 %v825_v19 }
0x1de2   :  { %v829_v22 = vadd.s32 %v828_v20, %v826_v21 }
0x1de3   :  { %v533_v23 = vpop.xlane.xlu0 %532 }
0x1de4   :  { %vm534_vm7 = vcmp.eq.f32.partialorder %v531_v16, %v533_v23  ;;  %vm830_vm8 = vcmp.eq.s32.totalorder %v996_v4, %v829_v22  ;;  %vm831_vm9 = vcmp.eq.s32.totalorder %v999_v5, %v829_v22  ;;  %v539_v31 = vcvt.f32.s32 %v533_v23 }
0x1de5   :  { %v535_v25 = vsel %vm534_vm7, %v530_v24, -inf  ;;  %v834_v26 = vsel %vm830_vm8, inf, %v805_v50  ;;  %v835_v27 = vsel %vm831_vm9, inf, %v806_v51  ;;  %v833_v28 = vsel %vm831_vm9, 1, %v804_v49 }
0x1de6   :  { %536 = vmax.xlane.f32.xlu0 %v535_v25  ;;  %v836_v29 = vmin.f32 %v834_v26, %v835_v27  ;;  %v832_v30 = vsel %vm830_vm8, 1, %v1125_v48  ;;  %v540_v33 = vshll.u32 %v539_v31, 16 }
0x1de8   :  { %837 = vmin.xlane.f32.xlu1 %v836_v29 }
0x1e6f   :  { %v537_v32 = vpop.xlane.xlu0 %536 }
0x1e70   :  { %v538_v34 = vcvt.f32.s32 %v537_v32 }
0x1e71   :  { %v838_v36 = vpop.xlane.xlu1 %837 }
0x1e72   :  { %v541_v35 = vadd.s32 %v540_v33, %v538_v34  ;;  %vm839_vm10 = vcmp.eq.f32.partialorder %v834_v26, %v838_v36  ;;  %vm840_vm11 = vcmp.eq.f32.partialorder %v835_v27, %v838_v36 }
0x1e73   :  { %v841_v37 = vsel %vm839_vm10, %v996_v4, 256  ;;  %v842_v38 = vsel %vm840_vm11, %v999_v5, 256 }
0x1e74   :  { %vm542_vm12 = vcmp.eq.s32.totalorder %v996_v4, %v541_v35  ;;  %vm543_vm13 = vcmp.eq.s32.totalorder %v999_v5, %v541_v35  ;;  %vm843_vm14 = vcmp.lt.s32.totalorder %v841_v37, %v842_v38 }
0x1e75   :  { %v546_v40 = vsel %vm542_vm12, -inf, %v517_v63  ;;  %v547_v41 = vsel %vm543_vm13, -inf, %v518_v2  ;;  %v545_v42 = vsel %vm543_vm13, 1, %v516_v60  ;;  %v844_v44 = vsel %vm843_vm14, %v841_v37, %v842_v38 }
0x1e76   :  { %v548_v43 = vmax.f32 %v546_v40, %v547_v41  ;;  %v544_v45 = vsel %vm542_vm12, 1, %v1129_v59  ;;  %v846_v39 = vshra.s32 %v844_v44, 16  ;;  %v845_v47 = vand.u32 65535, %v844_v44 }
0x1e78   :  { %549 = vmax.xlane.f32.xlu0 %v548_v43  ;;  %v848_v46 = vcvt.s32.f32 %v846_v39  ;;  %v847_v52 = vcvt.s32.f32 %v845_v47 }
0x1e7a   :  { %849 = vmin.xlane.f32.xlu1 %v848_v46 }
0x1f01   :  { %v550_v48 = vpop.xlane.xlu0 %549 }
0x1f02   :  { %vm551_vm15 = vcmp.eq.f32.partialorder %v546_v40, %v550_v48  ;;  %vm552_vm0 = vcmp.eq.f32.partialorder %v547_v41, %v550_v48 }
0x1f03   :  { %v553_v49 = vsel %vm551_vm15, %v996_v4, 4294967295  ;;  %v554_v50 = vsel %vm552_vm0, %v999_v5, 4294967295  ;;  %v850_v51 = vpop.xlane.xlu1 %849 }
0x1f04   :  { %vm555_vm1 = vcmp.gt.s32.totalorder %v553_v49, %v554_v50  ;;  %vm851_vm2 = vcmp.eq.f32.partialorder %v848_v46, %v850_v51  ;;  %v856_v57 = vcvt.f32.s32 %v850_v51 }
0x1f05   :  { %v556_v53 = vsel %vm555_vm1, %v553_v49, %v554_v50  ;;  %v852_v54 = vsel %vm851_vm2, %v847_v52, inf }
0x1f06   :  { %v558_v55 = vshra.s32 %v556_v53, 16  ;;  %853 = vmin.xlane.f32.xlu1 %v852_v54  ;;  %v557_v58 = vand.u32 65535, %v556_v53  ;;  %v857_v60 = vshll.u32 %v856_v57, 16  ;;  %v976_v53 = vmov 4294967041  }
0x1f08   :  { %v560_v56 = vcvt.s32.f32 %v558_v55  ;;  %v559_v2 = vcvt.s32.f32 %v557_v58 }
0x1f0a   :  { %561 = vmax.xlane.f32.xlu0 %v560_v56 }
0x1f8f   :  { %v854_v59 = vpop.xlane.xlu1 %853 }
0x1f90   :  { %v855_v61 = vcvt.f32.s32 %v854_v59 }
0x1f92   :  { %v858_v62 = vadd.s32 %v857_v60, %v855_v61 }
0x1f93   :  { %v562_v63 = vpop.xlane.xlu0 %561 }
0x1f94   :  { %vm563_vm3 = vcmp.eq.f32.partialorder %v560_v56, %v562_v63  ;;  %vm859_vm4 = vcmp.eq.s32.totalorder %v996_v4, %v858_v62  ;;  %vm860_vm5 = vcmp.eq.s32.totalorder %v999_v5, %v858_v62  ;;  %v568_v9 = vcvt.f32.s32 %v562_v63 }
0x1f95   :  { %v564_v3 = vsel %vm563_vm3, %v559_v2, -inf  ;;  %v1147_v0 = vsel %vm860_vm5, 1, %v833_v28  ;;  %v863_v6 = vsel %vm859_vm4, inf, %v834_v26  ;;  %v864_v1 = vsel %vm860_vm5, inf, %v835_v27 }
0x1f96   :  { %565 = vmax.xlane.f32.xlu0 %v564_v3  ;;  %v865_v7 = vmin.f32 %v863_v6, %v864_v1  ;;  %v861_v8 = vsel %vm859_vm4, 1, %v832_v30  ;;  %v569_v11 = vshll.u32 %v568_v9, 16 }
0x1f98   :  { %866 = vmin.xlane.f32.xlu1 %v865_v7 }
0x201f   :  { %v566_v10 = vpop.xlane.xlu0 %565 }
0x2020   :  { %v567_v12 = vcvt.f32.s32 %v566_v10 }
0x2021   :  { %v867_v14 = vpop.xlane.xlu1 %866 }
0x2022   :  { %v570_v13 = vadd.s32 %v569_v11, %v567_v12  ;;  %vm868_vm6 = vcmp.eq.f32.partialorder %v863_v6, %v867_v14  ;;  %vm869_vm7 = vcmp.eq.f32.partialorder %v864_v1, %v867_v14 }
0x2023   :  { %v870_v15 = vsel %vm868_vm6, %v996_v4, 256  ;;  %v871_v16 = vsel %vm869_vm7, %v999_v5, 256 }
0x2024   :  { %vm571_vm8 = vcmp.eq.s32.totalorder %v996_v4, %v570_v13  ;;  %vm572_vm9 = vcmp.eq.s32.totalorder %v999_v5, %v570_v13  ;;  %vm872_vm10 = vcmp.lt.s32.totalorder %v870_v15, %v871_v16 }
0x2025   :  { %v574_v17 = vsel %vm572_vm9, 1, %v545_v42  ;;  %v575_v18 = vsel %vm571_vm8, -inf, %v546_v40  ;;  %v576_v19 = vsel %vm572_vm9, -inf, %v547_v41  ;;  %v573_v21 = vsel %vm571_vm8, 1, %v544_v45 }
0x2026   :  { %v577_v20 = vmax.f32 %v575_v18, %v576_v19  ;;  %v873_v22 = vsel %vm872_vm10, %v870_v15, %v871_v16 }
0x2027   :  { %v875_v23 = vshra.s32 %v873_v22, 16  ;;  %v874_v25 = vand.u32 65535, %v873_v22 }
0x2028   :  { %578 = vmax.xlane.f32.xlu0 %v577_v20 }
0x2029   :  { %v877_v24 = vcvt.s32.f32 %v875_v23  ;;  %v876_v30 = vcvt.s32.f32 %v874_v25 }
0x202b   :  { %878 = vmin.xlane.f32.xlu1 %v877_v24 }
0x20b1   :  { %v579_v26 = vpop.xlane.xlu0 %578 }
0x20b2   :  { %vm580_vm11 = vcmp.eq.f32.partialorder %v575_v18, %v579_v26  ;;  %vm581_vm12 = vcmp.eq.f32.partialorder %v576_v19, %v579_v26 }
0x20b3   :  { %v582_v27 = vsel %vm580_vm11, %v996_v4, 4294967295  ;;  %v583_v28 = vsel %vm581_vm12, %v999_v5, 4294967295 }
0x20b4   :  { %vm584_vm13 = vcmp.gt.s32.totalorder %v582_v27, %v583_v28  ;;  %v879_v29 = vpop.xlane.xlu1 %878 }
0x20b5   :  { %vm880_vm14 = vcmp.eq.f32.partialorder %v877_v24, %v879_v29  ;;  %v585_v31 = vsel %vm584_vm13, %v582_v27, %v583_v28  ;;  %v885_v41 = vcvt.f32.s32 %v879_v29 }
0x20b6   :  { %v881_v32 = vsel %vm880_vm14, %v876_v30, inf  ;;  %v587_v33 = vshra.s32 %v585_v31, 16  ;;  %v586_v35 = vand.u32 65535, %v585_v31 }
0x20b7   :  { %882 = vmin.xlane.f32.xlu1 %v881_v32  ;;  %v886_v43 = vshll.u32 %v885_v41, 16 }
0x20b8   :  { %v589_v34 = vcvt.s32.f32 %v587_v33  ;;  %v588_v37 = vcvt.s32.f32 %v586_v35 }
0x20ba   :  { %590 = vmax.xlane.f32.xlu0 %v589_v34 }
0x2140   :  { %v883_v40 = vpop.xlane.xlu1 %882 }
0x2141   :  { %v884_v42 = vcvt.f32.s32 %v883_v40 }
0x2143   :  { %v591_v36 = vpop.xlane.xlu0 %590  ;;  %v887_v44 = vadd.s32 %v886_v43, %v884_v42 }
0x2144   :  { %vm592_vm15 = vcmp.eq.f32.partialorder %v589_v34, %v591_v36  ;;  %v597_v45 = vcvt.f32.s32 %v591_v36 }
0x2145   :  { %v593_v38 = vsel %vm592_vm15, %v588_v37, -inf  ;;  %vm888_vm0 = vcmp.eq.s32.totalorder %v996_v4, %v887_v44  ;;  %vm889_vm1 = vcmp.eq.s32.totalorder %v999_v5, %v887_v44 }
0x2146   :  { %594 = vmax.xlane.f32.xlu0 %v593_v38  ;;  %v598_v46 = vshll.u32 %v597_v45, 16  ;;  %v890_v49 = vsel %vm888_vm0, 1, %v861_v8  ;;  %v891_v50 = vsel %vm889_vm1, 1, %v1147_v0 }
0x2147   :  { %vm894_vm4 = vcmp.eq.s32.totalorder %v890_v49, 0  ;;  %vm895_vm8 = vcmp.eq.s32.totalorder %v891_v50, 0  ;;  %vm898_vm11 = vcmp.eq.s32.totalorder %v890_v49, 1  ;;  %vm899_vm13 = vcmp.eq.s32.totalorder %v891_v50, 1 }
0x21cf   :  { %v595_v39 = vpop.xlane.xlu0 %594 }
0x21d0   :  { %v596_v47 = vcvt.f32.s32 %v595_v39 }
0x21d2   :  { %v599_v48 = vadd.s32 %v598_v46, %v596_v47 }
0x21d4   :  { %vm600_vm2 = vcmp.eq.s32.totalorder %v996_v4, %v599_v48  ;;  %vm601_vm3 = vcmp.eq.s32.totalorder %v999_v5, %v599_v48 }
0x21d5   :  { %v602_v51 = vsel %vm600_vm2, 1, %v573_v21  ;;  %v603_v52 = vsel %vm601_vm3, 1, %v574_v17 }
0x21d6   :  { %vm892_vm5 = vcmp.eq.s32.totalorder %v602_v51, 1  ;;  %vm893_vm6 = vcmp.eq.s32.totalorder %v603_v52, 1  ;;  %vm900_vm7 = vcmp.eq.s32.totalorder %v602_v51, 0  ;;  %vm901_vm9 = vcmp.eq.s32.totalorder %v603_v52, 0 }
0x21d7   :  { %vm896_vm10 = vmand %vm892_vm5, %vm894_vm4 }
0x21d8   :  { %vm897_vm12 = vmand %vm893_vm6, %vm895_vm8  ;;  %v904_v54 = vsel %vm896_vm10, 1, %v976_v53 }
0x21d9   :  { %vm902_vm14 = vmand %vm898_vm11, %vm900_vm7  ;;  %v905_v4 = vsel %vm897_vm12, 1, %v976_v53 }
0x21da   :  { %vm903_vm15 = vmand %vm899_vm13, %vm901_vm9  ;;  %v906_v5 = vsel %vm902_vm14, 0, %v904_v54 }
0x21db   :  { %v907_v55 = vsel %vm903_vm15, 0, %v905_v4  ;;  %908 = vst [vmem:[#allocation5] sm:$0xff] %v906_v5 }
0x21dc   :  { %909 = vst [vmem:[#allocation5 + $0x8] sm:$0xff] %v907_v55 }
0x21dd   :  { %960 = shalt.err (!%p957_p9)
}
0x21de   :  { %919 = dma.vmem_to_hbm [thread:$0]  %s917_s11, 256, %s1164_s1, [#allocation4]  }
0x21df   :  { %971 = dma.done.wait [#allocation4], 256  }
0x21e0   :  { %972 = vsyncadd [#allocation4], 4294967040 }
0x21e1   :  { %923 = vsyncpa [#allocation3], 1 }
0x21e2   :  { %924 = vsyncpa [#allocation4], 1 }

</bundles_post_ra>
